<compile_context>
chip_gen: v7x
topology: tpu7x:2x2x1
jax: 0.10.0
libtpu: 0.0.40
codegen_flags: <defaults>
</compile_context>

<pallas_src>
import jax
import jax.numpy as jnp
from jax.experimental import pallas as pl
from jax.experimental.pallas import tpu as pltpu

# ----------------------------- configuration --------------------------------
N_TASKS = 2
NUM_CLASSES = (3, 5)
N_NODES = sum(NUM_CLASSES)            # 8
INPUT_CHANNELS = 32                   # C
DECODER_CHANNELS = (16,)
PENULT = DECODER_CHANNELS[-1]         # 16
GNN_CHANNELS = 32                     # G
GNN_LAYERS = 4
GNN_RESIDUAL = True
ALPHA = 0.2                           # LeakyReLU slope
BATCH = 2
H = W = 8
HW = H * W
N_LAY_FEATS = 3                       # forward() requires exactly 3 layer feats
N_GROUPS = 1 + N_LAY_FEATS            # x + 3 layer features
ROWS = N_GROUPS * BATCH               # 8 pooled rows processed together
FLAT_NG = N_NODES * GNN_CHANNELS      # 256 = flattened (node, gnn_channel) width
PAD = 128                             # lane-dense padding for the tiny heads
HP_W = PAD + FLAT_NG                  # 384: fused [head | proj] width
LOGIT_OFF = FLAT_NG                   # 256
NODE_OFF = FLAT_NG + PAD              # 384
OUT_W = FLAT_NG + 2 * PAD             # 512: single lane-dense output slab

# small-weights slab layout (one input DMA for every tiny weight/bias)
MLP_COL = 0                           # cols [0, 2P)        : w_mlp / b_mlp
HP_COL = PAD                          # cols [128, 128+384) : fused w_head|w_proj
BIAS_ROW = 32                         # row 32              : b_mlp / b_hp
BEFF_ROW = 33                         # rows 33..36         : per-layer GNN eff. bias
BLIN_ROW = BEFF_ROW + GNN_LAYERS      # row 37              : linear_class bias
SLAB_ROWS = 40
SLAB_COLS = OUT_W                     # 512

VMEM = pltpu.MemorySpace.VMEM


# ------------------------------ fused kernel ---------------------------------
def ctgnn_kernel(feat_ref, wslab_ref, wlin_ref, kron_hbm, out_ref,
                 kron_vmem, sem):
    # Kick off the 1 MiB Kron weight DMA first so it overlaps the whole
    # pool / mlp / head / projection phase; waited on just before the GNN loop.
    kron_cp = pltpu.make_async_copy(kron_hbm, kron_vmem, sem)
    kron_cp.start()

    # --- AdaptiveAvgPool2d((1,1)) for all 4 feature groups at once -----------
    # (1/HW scale is folded into w_mlp, so a plain sum suffices.)
    pooled = jnp.sum(feat_ref[...], axis=-1)                           # (8, C)

    # --- both task mlps in one matmul: columns [0:P] task0, [P:2P] task1 -----
    w_mlp = wslab_ref[0:INPUT_CHANNELS, MLP_COL:MLP_COL + 2 * PENULT]  # (C, 2P)
    b_mlp = wslab_ref[BIAS_ROW:BIAS_ROW + 1, MLP_COL:MLP_COL + 2 * PENULT]
    h = jnp.dot(pooled, w_mlp, preferred_element_type=jnp.float32) + b_mlp
    h = jnp.maximum(h, 0.0)                                            # ReLU, (8, 2P)

    # --- fused classifier heads + feature projections (block-diagonal) -------
    # lanes [0:128) = logits (padded), lanes [128:384) = node-feature proj.
    w_hp = wslab_ref[0:2 * PENULT, HP_COL:HP_COL + HP_W]               # (2P, 384)
    b_hp = wslab_ref[BIAS_ROW:BIAS_ROW + 1, HP_COL:HP_COL + HP_W]
    hp = jnp.dot(h, w_hp, preferred_element_type=jnp.float32) + b_hp   # (8, 384)
    logits = hp[:, 0:PAD]                                              # (8, 128)
    pz = hp[:, PAD:PAD + FLAT_NG]                                      # (8, 256)
    p = jnp.where(pz > 0.0, pz, ALPHA * pz)                            # LeakyReLU

    # fe / logits are ready: stream them out while the kron DMA still lands.
    out_ref[:, 0:FLAT_NG] = p[0:BATCH, :]                              # fe (both tasks)
    out_ref[:, LOGIT_OFF:LOGIT_OFF + PAD] = logits[0:BATCH, :]         # per-task logits

    # --- cross-task GNN: one Kron-expanded (N*G x N*G) matmul per layer ------
    # adj @ (h @ W_l + b_l) [+ h]  ==  h_flat @ (kron(adj.T, W_l) + I) + kron(rowsum, b_l)
    kron_cp.wait()
    hg = p[0:BATCH, :]                                                 # (B, N*G)
    for l in range(GNN_LAYERS):
        if 0 < l < 4 and (l - 1) < N_LAY_FEATS:
            hg = hg + p[l * BATCH:(l + 1) * BATCH, :]                  # += lay_feats[l-1]
        beff_l = wslab_ref[BEFF_ROW + l:BEFF_ROW + l + 1, 0:FLAT_NG]   # (1, N*G)
        agg = jnp.dot(hg, kron_vmem[l],
                      preferred_element_type=jnp.float32) + beff_l
        hg = jnp.where(agg > 0.0, agg, ALPHA * agg)                    # LeakyReLU

    # --- shared linear_class: Linear(G, 1) per node, lane-padded to 128 ------
    b_lin = wslab_ref[BLIN_ROW:BLIN_ROW + 1, 0:PAD]
    nodes = jnp.dot(hg, wlin_ref[...],
                    preferred_element_type=jnp.float32) + b_lin        # (B, 128)
    out_ref[:, NODE_OFF:NODE_OFF + PAD] = nodes                        # GNN node scores


# ------------------------------ parameters -----------------------------------
def init_params():
    key = jax.random.PRNGKey(42)

    def nxt():
        nonlocal key
        key, sub = jax.random.split(key)
        return sub

    s = 0.1
    tasks = []
    for t in range(N_TASKS):
        nc = NUM_CLASSES[t]
        tasks.append(dict(
            w_mlp=s * jax.random.normal(nxt(), (INPUT_CHANNELS, PENULT), jnp.float32),
            b_mlp=s * jax.random.normal(nxt(), (1, PENULT), jnp.float32),
            w_head=s * jax.random.normal(nxt(), (PENULT, nc), jnp.float32),
            b_head=s * jax.random.normal(nxt(), (1, nc), jnp.float32),
            w_proj=s * jax.random.normal(nxt(), (PENULT, GNN_CHANNELS * nc), jnp.float32),
            b_proj=s * jax.random.normal(nxt(), (1, GNN_CHANNELS * nc), jnp.float32),
        ))
    idx = jnp.arange(N_NODES)
    adj = (jnp.abs(idx[:, None] - idx[None, :]) <= 1).astype(jnp.float32)
    return dict(
        tasks=tasks,
        adj=adj,
        gnn_w=s * jax.random.normal(nxt(), (GNN_LAYERS, GNN_CHANNELS, GNN_CHANNELS), jnp.float32),
        gnn_b=s * jax.random.normal(nxt(), (GNN_LAYERS, GNN_CHANNELS), jnp.float32),
        w_lin=s * jax.random.normal(nxt(), (1, GNN_CHANNELS), jnp.float32),
        b_lin=s * jax.random.normal(nxt(), (1, 1), jnp.float32),
    )


def pack_params(raw):
    """One-time weight repacking (outside the jitted forward):
    - per-task mlps concatenated column-wise (1/HW pool scale folded in),
    - heads (128-lane pad) and feature projections block-diagonalised and
      fused column-wise into one (2P, 384) matrix,
    - GNN layers Kron-expanded with the 'Pre' residual folded in
      (kron_eff = kron(adj.T, W_l) + I), effective bias from adj rowsum,
    - all small weights/biases packed into ONE lane-dense (40, 512) slab."""
    t0, t1 = raw['tasks']
    nc0 = NUM_CLASSES[0]
    G, P, N, L = GNN_CHANNELS, PENULT, N_NODES, GNN_LAYERS

    w_mlp = jnp.concatenate([t0['w_mlp'], t1['w_mlp']], axis=1) / float(HW)  # (C, 2P)
    b_mlp = jnp.concatenate([t0['b_mlp'], t1['b_mlp']], axis=1)              # (1, 2P)

    w_head = jnp.zeros((2 * P, PAD), jnp.float32)
    w_head = w_head.at[0:P, 0:nc0].set(t0['w_head'])
    w_head = w_head.at[P:2 * P, nc0:N].set(t1['w_head'])
    b_head = jnp.zeros((1, PAD), jnp.float32)
    b_head = b_head.at[:, 0:nc0].set(t0['b_head'])
    b_head = b_head.at[:, nc0:N].set(t1['b_head'])

    w_proj = jnp.zeros((2 * P, FLAT_NG), jnp.float32)
    w_proj = w_proj.at[0:P, 0:nc0 * G].set(t0['w_proj'])
    w_proj = w_proj.at[P:2 * P, nc0 * G:].set(t1['w_proj'])
    b_proj = jnp.concatenate([t0['b_proj'], t1['b_proj']], axis=1)           # (1, N*G)

    w_hp = jnp.concatenate([w_head, w_proj], axis=1)                         # (2P, 384)
    b_hp = jnp.concatenate([b_head, b_proj], axis=1)                         # (1, 384)

    adj = raw['adj']                                                         # raw binary adj
    eye = jnp.eye(FLAT_NG, dtype=jnp.float32)
    kron = jnp.stack(
        [jnp.kron(adj.T, raw['gnn_w'][l]) + (eye if GNN_RESIDUAL else 0.0)
         for l in range(L)], axis=0)                                         # (L, 256, 256)
    rowsum = jnp.sum(adj, axis=1)
    beff = jnp.stack([jnp.kron(rowsum, raw['gnn_b'][l]) for l in range(L)],
                     axis=0)                                                 # (L, 256)

    eye_pad = jnp.eye(N, PAD, dtype=jnp.float32)
    w_lin = jnp.kron(eye_pad, raw['w_lin'].reshape(G, 1))                    # (N*G, 128)
    b_lin = jnp.zeros((PAD,), jnp.float32).at[0:N].set(raw['b_lin'][0, 0])

    slab = jnp.zeros((SLAB_ROWS, SLAB_COLS), jnp.float32)
    slab = slab.at[0:INPUT_CHANNELS, MLP_COL:MLP_COL + 2 * P].set(w_mlp)
    slab = slab.at[BIAS_ROW, MLP_COL:MLP_COL + 2 * P].set(b_mlp[0])
    slab = slab.at[0:2 * P, HP_COL:HP_COL + HP_W].set(w_hp)
    slab = slab.at[BIAS_ROW, HP_COL:HP_COL + HP_W].set(b_hp[0])
    slab = slab.at[BEFF_ROW:BEFF_ROW + L, 0:FLAT_NG].set(beff)
    slab = slab.at[BLIN_ROW, 0:PAD].set(b_lin)

    return dict(wslab=slab, w_lin=w_lin, kron=kron)


# ------------------------------- forward --------------------------------------
def ctgnn_forward(packed, x, lays_feat):
    assert len(lays_feat) == N_LAY_FEATS
    # one stacked input instead of 4 separate DMAs (64 KiB wrapper-side copy)
    feat = jnp.concatenate(
        [x.reshape(BATCH, INPUT_CHANNELS, HW)]
        + [f.reshape(BATCH, INPUT_CHANNELS, HW) for f in lays_feat],
        axis=0)                                                        # (8, C, HW)

    cost = pl.CostEstimate(
        flops=2 * (ROWS * INPUT_CHANNELS * 2 * PENULT
                   + ROWS * 2 * PENULT * HP_W
                   + GNN_LAYERS * BATCH * FLAT_NG * FLAT_NG
                   + BATCH * FLAT_NG * PAD),
        transcendentals=0,
        bytes_accessed=4 * (feat.size + packed['wslab'].size
                            + packed['w_lin'].size + packed['kron'].size
                            + BATCH * OUT_W),
    )

    slab = pl.pallas_call(
        ctgnn_kernel,
        out_shape=jax.ShapeDtypeStruct((BATCH, OUT_W), jnp.float32),
        in_specs=[
            pl.BlockSpec(memory_space=VMEM),      # stacked input features
            pl.BlockSpec(memory_space=VMEM),      # small-weights slab
            pl.BlockSpec(memory_space=VMEM),      # w_lin (node scorer)
            pl.BlockSpec(memory_space=pl.ANY),    # kron stays in HBM -> manual DMA
        ],
        out_specs=pl.BlockSpec(memory_space=VMEM),
        scratch_shapes=[
            pltpu.VMEM((GNN_LAYERS, FLAT_NG, FLAT_NG), jnp.float32),   # kron landing buf
            pltpu.SemaphoreType.DMA(()),
        ],
        cost_estimate=cost,
    )(feat, packed['wslab'], packed['w_lin'], packed['kron'])

    nc0 = NUM_CLASSES[0]
    fe = (slab[:, 0:GNN_CHANNELS * nc0],
          slab[:, GNN_CHANNELS * nc0:FLAT_NG])
    logits = slab[:, LOGIT_OFF:LOGIT_OFF + N_NODES]
    feats = (logits[:, 0:nc0], logits[:, nc0:N_NODES])
    nodes = slab[:, NODE_OFF:NODE_OFF + N_NODES]
    task_scores = (nodes[:, 0:nc0], nodes[:, nc0:N_NODES])
    return task_scores, feats, fe


# ------------------------- pure-JAX reference (check) --------------------------
def ctgnn_reference(raw, x, lays_feat):
    hp = jax.lax.Precision.HIGHEST

    def pool(t):
        return jnp.mean(t.reshape(t.shape[0], t.shape[1], -1), axis=-1)

    pooled = [pool(x)] + [pool(f) for f in lays_feat]
    feats, fe = [], []
    node_chunks = []
    lay_chunks = [[] for _ in range(N_LAY_FEATS)]
    for t in range(N_TASKS):
        pr = raw['tasks'][t]

        def mlp(z):
            return jnp.maximum(jnp.dot(z, pr['w_mlp'], precision=hp) + pr['b_mlp'], 0.0)

        def proj(z):
            q = jnp.dot(z, pr['w_proj'], precision=hp) + pr['b_proj']
            return jnp.where(q > 0, q, ALPHA * q)

        hx = mlp(pooled[0])
        feats.append(jnp.dot(hx, pr['w_head'], precision=hp) + pr['b_head'])
        px = proj(hx)
        fe.append(px)
        node_chunks.append(px.reshape(BATCH, NUM_CLASSES[t], GNN_CHANNELS))
        for i in range(N_LAY_FEATS):
            pi = proj(mlp(pooled[1 + i]))
            lay_chunks[i].append(pi.reshape(BATCH, NUM_CLASSES[t], GNN_CHANNELS))

    h = jnp.concatenate(node_chunks, axis=1)                         # (B, N, G)
    lays = [jnp.concatenate(lc, axis=1) for lc in lay_chunks]
    adj = raw['adj']
    for l in range(GNN_LAYERS):
        if 0 < l < 4 and (l - 1) < N_LAY_FEATS:
            h = h + lays[l - 1]
        support = jnp.einsum('bng,gk->bnk', h, raw['gnn_w'][l], precision=hp) + raw['gnn_b'][l]
        agg = jnp.einsum('nm,bmk->bnk', adj, support, precision=hp)
        if GNN_RESIDUAL:
            agg = agg + h
        h = jnp.where(agg > 0, agg, ALPHA * agg)
    nodes = jnp.einsum('bng,g->bn', h, raw['w_lin'][0], precision=hp) + raw['b_lin'][0, 0]
    nc0 = NUM_CLASSES[0]
    return ((nodes[:, 0:nc0], nodes[:, nc0:]), tuple(feats), tuple(fe))


# ---------------------------------- main ---------------------------------------
if __name__ == "__main__":
    raw = init_params()
    packed = pack_params(raw)

    key = jax.random.PRNGKey(0)
    kx, k0, k1, k2 = jax.random.split(key, 4)
    x = jax.random.normal(kx, (BATCH, INPUT_CHANNELS, H, W), jnp.float32)
    lays_feat = (
        jax.random.normal(k0, (BATCH, INPUT_CHANNELS, H, W), jnp.float32),
        jax.random.normal(k1, (BATCH, INPUT_CHANNELS, H, W), jnp.float32),
        jax.random.normal(k2, (BATCH, INPUT_CHANNELS, H, W), jnp.float32),
    )

    fwd = jax.jit(ctgnn_forward)
    task_scores, feats, fe = fwd(packed, x, lays_feat)
    jax.block_until_ready((task_scores, feats, fe))

    assert task_scores[0].shape == (BATCH, NUM_CLASSES[0])
    assert task_scores[1].shape == (BATCH, NUM_CLASSES[1])
    assert feats[0].shape == (BATCH, NUM_CLASSES[0])
    assert feats[1].shape == (BATCH, NUM_CLASSES[1])
    assert fe[0].shape == (BATCH, GNN_CHANNELS * NUM_CLASSES[0])
    assert fe[1].shape == (BATCH, GNN_CHANNELS * NUM_CLASSES[1])

    # numerical sanity check against a pure-JAX reference with the same semantics
    ref_scores, ref_feats, ref_fe = jax.jit(ctgnn_reference)(raw, x, lays_feat)
    for got, want in zip(task_scores + feats + fe, ref_scores + ref_feats + ref_fe):
        err = float(jnp.max(jnp.abs(got - want)))
        assert err < 5e-3, f"mismatch vs reference: max abs err {err}"

    print("KERNEL_OK")
</pallas_src>

<mosaic_0001>
module attributes {stable_mosaic.version = 11 : i64} {
  func.func @ctgnn_kernel(%arg0: memref<8x32x64xf32, #tpu.memory_space<vmem>>, %arg1: memref<40x512xf32, #tpu.memory_space<vmem>>, %arg2: memref<256x128xf32, #tpu.memory_space<vmem>>, %arg3: memref<4x256x256xf32, #tpu.memory_space<any>>, %arg4: memref<2x512xf32, #tpu.memory_space<vmem>>, %arg5: memref<4x256x256xf32, #tpu.memory_space<vmem>>, %arg6: memref<!tpu.dma_semaphore, #tpu.memory_space<semaphore_mem>>) attributes {dimension_semantics = [], scalar_prefetch = 0 : i64, scratch_operands = 2 : i64, tpu.core_type = #tpu.core_type<tc>} {
    tpu.enqueue_dma source(%arg3 : memref<4x256x256xf32, #tpu.memory_space<any>>) target(%arg5 : memref<4x256x256xf32, #tpu.memory_space<vmem>>) target_semaphore(%arg6 : memref<!tpu.dma_semaphore, #tpu.memory_space<semaphore_mem>>)
    %c0 = arith.constant 0 : index
    %c0_0 = arith.constant 0 : index
    %c0_1 = arith.constant 0 : index
    %0 = vector.load %arg0[%c0, %c0_0, %c0_1] : memref<8x32x64xf32, #tpu.memory_space<vmem>>, vector<8x32x64xf32>
    %cst = arith.constant dense<0.000000e+00> : vector<8x32xf32>
    %1 = vector.multi_reduction <add>, %0, %cst [2] : vector<8x32x64xf32> to vector<8x32xf32>
    %c0_2 = arith.constant 0 : index
    %c0_3 = arith.constant 0 : index
    %2 = vector.load %arg1[%c0_2, %c0_3] : memref<40x512xf32, #tpu.memory_space<vmem>>, vector<32x32xf32>
    %c32 = arith.constant 32 : index
    %c0_4 = arith.constant 0 : index
    %3 = vector.load %arg1[%c32, %c0_4] : memref<40x512xf32, #tpu.memory_space<vmem>>, vector<1x32xf32>
    %cst_5 = arith.constant dense<0.000000e+00> : vector<8x32xf32>
    %4 = tpu.matmul %1, %2, %cst_5 {dimension_numbers = #tpu.dot_dimension_numbers<[1], [0], [0], [1], [0, 0, 1, 1], [], []>} : vector<8x32xf32>, vector<32x32xf32>, vector<8x32xf32> -> vector<8x32xf32>
    %5 = vector.broadcast %3 : vector<1x32xf32> to vector<8x32xf32>
    %6 = arith.addf %4, %5 : vector<8x32xf32>
    %cst_6 = arith.constant 0.000000e+00 : f32
    %7 = vector.broadcast %cst_6 : f32 to vector<8x32xf32>
    %8 = arith.maximumf %6, %7 : vector<8x32xf32>
    %c0_7 = arith.constant 0 : index
    %c128 = arith.constant 128 : index
    %9 = vector.load %arg1[%c0_7, %c128] : memref<40x512xf32, #tpu.memory_space<vmem>>, vector<32x384xf32>
    %c32_8 = arith.constant 32 : index
    %c128_9 = arith.constant 128 : index
    %10 = vector.load %arg1[%c32_8, %c128_9] : memref<40x512xf32, #tpu.memory_space<vmem>>, vector<1x384xf32>
    %cst_10 = arith.constant dense<0.000000e+00> : vector<8x384xf32>
    %11 = tpu.matmul %8, %9, %cst_10 {dimension_numbers = #tpu.dot_dimension_numbers<[1], [0], [0], [1], [0, 0, 1, 1], [], []>} : vector<8x32xf32>, vector<32x384xf32>, vector<8x384xf32> -> vector<8x384xf32>
    %12 = vector.broadcast %10 : vector<1x384xf32> to vector<8x384xf32>
    %13 = arith.addf %11, %12 : vector<8x384xf32>
    %14 = vector.extract_strided_slice %13 {offsets = [0, 0], sizes = [8, 128], strides = [1, 1]} : vector<8x384xf32> to vector<8x128xf32>
    %15 = vector.extract_strided_slice %13 {offsets = [0, 128], sizes = [8, 256], strides = [1, 1]} : vector<8x384xf32> to vector<8x256xf32>
    %cst_11 = arith.constant 0.000000e+00 : f32
    %16 = vector.broadcast %cst_11 : f32 to vector<8x256xf32>
    %17 = arith.cmpf ogt, %15, %16 : vector<8x256xf32>
    %cst_12 = arith.constant 2.000000e-01 : f32
    %18 = vector.broadcast %cst_12 : f32 to vector<8x256xf32>
    %19 = arith.mulf %18, %15 : vector<8x256xf32>
    %20 = arith.select %17, %15, %19 : vector<8x256xi1>, vector<8x256xf32>
    %21 = vector.extract_strided_slice %20 {offsets = [0, 0], sizes = [2, 256], strides = [1, 1]} : vector<8x256xf32> to vector<2x256xf32>
    %c0_13 = arith.constant 0 : index
    %c0_14 = arith.constant 0 : index
    %22 = vector.load %arg4[%c0_13, %c0_14] : memref<2x512xf32, #tpu.memory_space<vmem>>, vector<2x256xf32>
    tpu.vector_store %arg4[%c0_13, %c0_14], %21 {strides = array<i32>} : memref<2x512xf32, #tpu.memory_space<vmem>>, vector<2x256xf32>,
    %23 = vector.extract_strided_slice %14 {offsets = [0, 0], sizes = [2, 128], strides = [1, 1]} : vector<8x128xf32> to vector<2x128xf32>
    %c0_15 = arith.constant 0 : index
    %c256 = arith.constant 256 : index
    %24 = vector.load %arg4[%c0_15, %c256] : memref<2x512xf32, #tpu.memory_space<vmem>>, vector<2x128xf32>
    tpu.vector_store %arg4[%c0_15, %c256], %23 {strides = array<i32>} : memref<2x512xf32, #tpu.memory_space<vmem>>, vector<2x128xf32>,
    tpu.wait_dma2 semaphore(%arg6 : memref<!tpu.dma_semaphore, #tpu.memory_space<semaphore_mem>>) src(%arg3 : memref<4x256x256xf32, #tpu.memory_space<any>>) dst(%arg5 : memref<4x256x256xf32, #tpu.memory_space<vmem>>)
    %25 = vector.extract_strided_slice %20 {offsets = [0, 0], sizes = [2, 256], strides = [1, 1]} : vector<8x256xf32> to vector<2x256xf32>
    %c33 = arith.constant 33 : index
    %c0_16 = arith.constant 0 : index
    %26 = vector.load %arg1[%c33, %c0_16] : memref<40x512xf32, #tpu.memory_space<vmem>>, vector<1x256xf32>
    %c0_17 = arith.constant 0 : index
    %c0_18 = arith.constant 0 : index
    %c0_19 = arith.constant 0 : index
    %27 = vector.load %arg5[%c0_17, %c0_18, %c0_19] : memref<4x256x256xf32, #tpu.memory_space<vmem>>, vector<1x256x256xf32>
    %28 = vector.shape_cast %27 : vector<1x256x256xf32> to vector<256x256xf32>
    %cst_20 = arith.constant dense<0.000000e+00> : vector<2x256xf32>
    %29 = tpu.matmul %25, %28, %cst_20 {dimension_numbers = #tpu.dot_dimension_numbers<[1], [0], [0], [1], [0, 0, 1, 1], [], []>} : vector<2x256xf32>, vector<256x256xf32>, vector<2x256xf32> -> vector<2x256xf32>
    %30 = vector.broadcast %26 : vector<1x256xf32> to vector<2x256xf32>
    %31 = arith.addf %29, %30 : vector<2x256xf32>
    %cst_21 = arith.constant 0.000000e+00 : f32
    %32 = vector.broadcast %cst_21 : f32 to vector<2x256xf32>
    %33 = arith.cmpf ogt, %31, %32 : vector<2x256xf32>
    %cst_22 = arith.constant 2.000000e-01 : f32
    %34 = vector.broadcast %cst_22 : f32 to vector<2x256xf32>
    %35 = arith.mulf %34, %31 : vector<2x256xf32>
    %36 = arith.select %33, %31, %35 : vector<2x256xi1>, vector<2x256xf32>
    %37 = vector.extract_strided_slice %20 {offsets = [2, 0], sizes = [2, 256], strides = [1, 1]} : vector<8x256xf32> to vector<2x256xf32>
    %38 = arith.addf %36, %37 : vector<2x256xf32>
    %c34 = arith.constant 34 : index
    %c0_23 = arith.constant 0 : index
    %39 = vector.load %arg1[%c34, %c0_23] : memref<40x512xf32, #tpu.memory_space<vmem>>, vector<1x256xf32>
    %c1 = arith.constant 1 : index
    %c0_24 = arith.constant 0 : index
    %c0_25 = arith.constant 0 : index
    %40 = vector.load %arg5[%c1, %c0_24, %c0_25] : memref<4x256x256xf32, #tpu.memory_space<vmem>>, vector<1x256x256xf32>
    %41 = vector.shape_cast %40 : vector<1x256x256xf32> to vector<256x256xf32>
    %cst_26 = arith.constant dense<0.000000e+00> : vector<2x256xf32>
    %42 = tpu.matmul %38, %41, %cst_26 {dimension_numbers = #tpu.dot_dimension_numbers<[1], [0], [0], [1], [0, 0, 1, 1], [], []>} : vector<2x256xf32>, vector<256x256xf32>, vector<2x256xf32> -> vector<2x256xf32>
    %43 = vector.broadcast %39 : vector<1x256xf32> to vector<2x256xf32>
    %44 = arith.addf %42, %43 : vector<2x256xf32>
    %cst_27 = arith.constant 0.000000e+00 : f32
    %45 = vector.broadcast %cst_27 : f32 to vector<2x256xf32>
    %46 = arith.cmpf ogt, %44, %45 : vector<2x256xf32>
    %cst_28 = arith.constant 2.000000e-01 : f32
    %47 = vector.broadcast %cst_28 : f32 to vector<2x256xf32>
    %48 = arith.mulf %47, %44 : vector<2x256xf32>
    %49 = arith.select %46, %44, %48 : vector<2x256xi1>, vector<2x256xf32>
    %50 = vector.extract_strided_slice %20 {offsets = [4, 0], sizes = [2, 256], strides = [1, 1]} : vector<8x256xf32> to vector<2x256xf32>
    %51 = arith.addf %49, %50 : vector<2x256xf32>
    %c35 = arith.constant 35 : index
    %c0_29 = arith.constant 0 : index
    %52 = vector.load %arg1[%c35, %c0_29] : memref<40x512xf32, #tpu.memory_space<vmem>>, vector<1x256xf32>
    %c2 = arith.constant 2 : index
    %c0_30 = arith.constant 0 : index
    %c0_31 = arith.constant 0 : index
    %53 = vector.load %arg5[%c2, %c0_30, %c0_31] : memref<4x256x256xf32, #tpu.memory_space<vmem>>, vector<1x256x256xf32>
    %54 = vector.shape_cast %53 : vector<1x256x256xf32> to vector<256x256xf32>
    %cst_32 = arith.constant dense<0.000000e+00> : vector<2x256xf32>
    %55 = tpu.matmul %51, %54, %cst_32 {dimension_numbers = #tpu.dot_dimension_numbers<[1], [0], [0], [1], [0, 0, 1, 1], [], []>} : vector<2x256xf32>, vector<256x256xf32>, vector<2x256xf32> -> vector<2x256xf32>
    %56 = vector.broadcast %52 : vector<1x256xf32> to vector<2x256xf32>
    %57 = arith.addf %55, %56 : vector<2x256xf32>
    %cst_33 = arith.constant 0.000000e+00 : f32
    %58 = vector.broadcast %cst_33 : f32 to vector<2x256xf32>
    %59 = arith.cmpf ogt, %57, %58 : vector<2x256xf32>
    %cst_34 = arith.constant 2.000000e-01 : f32
    %60 = vector.broadcast %cst_34 : f32 to vector<2x256xf32>
    %61 = arith.mulf %60, %57 : vector<2x256xf32>
    %62 = arith.select %59, %57, %61 : vector<2x256xi1>, vector<2x256xf32>
    %63 = vector.extract_strided_slice %20 {offsets = [6, 0], sizes = [2, 256], strides = [1, 1]} : vector<8x256xf32> to vector<2x256xf32>
    %64 = arith.addf %62, %63 : vector<2x256xf32>
    %c36 = arith.constant 36 : index
    %c0_35 = arith.constant 0 : index
    %65 = vector.load %arg1[%c36, %c0_35] : memref<40x512xf32, #tpu.memory_space<vmem>>, vector<1x256xf32>
    %c3 = arith.constant 3 : index
    %c0_36 = arith.constant 0 : index
    %c0_37 = arith.constant 0 : index
    %66 = vector.load %arg5[%c3, %c0_36, %c0_37] : memref<4x256x256xf32, #tpu.memory_space<vmem>>, vector<1x256x256xf32>
    %67 = vector.shape_cast %66 : vector<1x256x256xf32> to vector<256x256xf32>
    %cst_38 = arith.constant dense<0.000000e+00> : vector<2x256xf32>
    %68 = tpu.matmul %64, %67, %cst_38 {dimension_numbers = #tpu.dot_dimension_numbers<[1], [0], [0], [1], [0, 0, 1, 1], [], []>} : vector<2x256xf32>, vector<256x256xf32>, vector<2x256xf32> -> vector<2x256xf32>
    %69 = vector.broadcast %65 : vector<1x256xf32> to vector<2x256xf32>
    %70 = arith.addf %68, %69 : vector<2x256xf32>
    %cst_39 = arith.constant 0.000000e+00 : f32
    %71 = vector.broadcast %cst_39 : f32 to vector<2x256xf32>
    %72 = arith.cmpf ogt, %70, %71 : vector<2x256xf32>
    %cst_40 = arith.constant 2.000000e-01 : f32
    %73 = vector.broadcast %cst_40 : f32 to vector<2x256xf32>
    %74 = arith.mulf %73, %70 : vector<2x256xf32>
    %75 = arith.select %72, %70, %74 : vector<2x256xi1>, vector<2x256xf32>
    %c37 = arith.constant 37 : index
    %c0_41 = arith.constant 0 : index
    %76 = vector.load %arg1[%c37, %c0_41] : memref<40x512xf32, #tpu.memory_space<vmem>>, vector<1x128xf32>
    %c0_42 = arith.constant 0 : index
    %c0_43 = arith.constant 0 : index
    %77 = vector.load %arg2[%c0_42, %c0_43] : memref<256x128xf32, #tpu.memory_space<vmem>>, vector<256x128xf32>
    %cst_44 = arith.constant dense<0.000000e+00> : vector<2x128xf32>
    %78 = tpu.matmul %75, %77, %cst_44 {dimension_numbers = #tpu.dot_dimension_numbers<[1], [0], [0], [1], [0, 0, 1, 1], [], []>} : vector<2x256xf32>, vector<256x128xf32>, vector<2x128xf32> -> vector<2x128xf32>
    %79 = vector.broadcast %76 : vector<1x128xf32> to vector<2x128xf32>
    %80 = arith.addf %78, %79 : vector<2x128xf32>
    %c0_45 = arith.constant 0 : index
    %c384 = arith.constant 384 : index
    %81 = vector.load %arg4[%c0_45, %c384] : memref<2x512xf32, #tpu.memory_space<vmem>>, vector<2x128xf32>
    tpu.vector_store %arg4[%c0_45, %c384], %80 {strides = array<i32>} : memref<2x512xf32, #tpu.memory_space<vmem>>, vector<2x128xf32>,
    return
  }
}

</mosaic_0001>

<bundles_post_ra>
// kernel: ctgnn_forward.1
= control target key start
LH: loop header
LB: loop body
LE: loop exit
PB: predicated region body
PF: predicated region fallthrough
CT: control target
= control target key end

     0   :  { %vm58_vm0 = vcmask 523264   ;;  %vm1803_vm1 = vmmov 0   ;;  %vm203_vm2 = vcmask 130112   ;;  %vm210_vm3 = vcmask 195712   ;;  %s1805_s7 = smov [#allocation2]   ;;  %s2300_s0 = inlined_call_operand.vmem [shape: f32[8,32,64], index: 0, kind: input, shape index: {}]   ;;  %s2301_s1 = inlined_call_operand.vmem [shape: f32[40,512], index: 1, kind: input, shape index: {}]   ;;  %s2302_s3 = inlined_call_operand.hbm [shape: f32[4,256,256], index: 3, kind: input, shape index: {}]   ;;  %s2303_s2 = inlined_call_operand.vmem [shape: f32[256,128], index: 2, kind: input, shape index: {}]   ;;  %s2304_s4 = inlined_call_operand.vmem [shape: f32[2,512], index: 4, kind: output, shape index: {}]  }
   0x1   :  { %v30_v0 = vld [vmem:[%s2300_s0 + $0x20] sm:$0xff]  ;;  %v31_v2 = vld [vmem:[%s2300_s0 + $0x28] sm:$0xff]  ;;  %v32_v8 = vld [vmem:[%s2300_s0 + $0x30] sm:$0xff]  ;;  %vm217_vm4 = vcmask 261312   ;;  %vm352_vm5 = vcmask 1041409   ;;  %vm354_vm6 = vcmask 1042434  }
   0x2   :  { %v26_v1 = vld [vmem:[%s2300_s0] sm:$0xff]  ;;  %v71_v3 = vsel %vm58_vm0, %v30_v0, 0.0  ;;  %v27_v5 = vld [vmem:[%s2300_s0 + $0x8] sm:$0xff]  ;;  %v74_v6 = vsel %vm58_vm0, %v31_v2, 0.0  ;;  %v28_v9 = vld [vmem:[%s2300_s0 + $0x10] sm:$0xff]  ;;  %v77_v10 = vsel %vm58_vm0, %v32_v8, 0.0 }
   0x3   :  { %v59_v4 = vsel %vm58_vm0, %v26_v1, 0.0  ;;  %72 = vadd.xlane.f32.xlu1 %v71_v3  ;;  %v62_v7 = vsel %vm58_vm0, %v27_v5, 0.0  ;;  %v65_v11 = vsel %vm58_vm0, %v28_v9, 0.0  ;;  %v35_v12 = vld [vmem:[%s2300_s0 + $0x48] sm:$0xff]  ;;  %v34_v13 = vld [vmem:[%s2300_s0 + $0x40] sm:$0xff]  ;;  %v33_v16 = vld [vmem:[%s2300_s0 + $0x38] sm:$0xff] }
   0x4   :  { %60 = vadd.xlane.f32.xlu0 %v59_v4  ;;  %v86_v14 = vsel %vm58_vm0, %v35_v12, 0.0  ;;  %v83_v15 = vsel %vm58_vm0, %v34_v13, 0.0  ;;  %v29_v17 = vld [vmem:[%s2300_s0 + $0x18] sm:$0xff]  ;;  %v80_v18 = vsel %vm58_vm0, %v33_v16, 0.0  ;;  %v38_v20 = vld [vmem:[%s2300_s0 + $0x60] sm:$0xff]  ;;  %v36_v21 = vld [vmem:[%s2300_s0 + $0x50] sm:$0xff] }
   0x5   :  { %v68_v19 = vsel %vm58_vm0, %v29_v17, 0.0  ;;  %v95_v22 = vsel %vm58_vm0, %v38_v20, 0.0  ;;  %v89_v23 = vsel %vm58_vm0, %v36_v21, 0.0  ;;  %v37_v24 = vld [vmem:[%s2300_s0 + $0x58] sm:$0xff]  ;;  %v39_v25 = vld [vmem:[%s2300_s0 + $0x68] sm:$0xff]  ;;  %v42_v28 = vld [vmem:[%s2300_s0 + $0x80] sm:$0xff] }
   0x6   :  { %v92_v26 = vsel %vm58_vm0, %v37_v24, 0.0  ;;  %v98_v27 = vsel %vm58_vm0, %v39_v25, 0.0  ;;  %v40_v29 = vld [vmem:[%s2300_s0 + $0x70] sm:$0xff]  ;;  %v107_v30 = vsel %vm58_vm0, %v42_v28, 0.0  ;;  %v41_v32 = vld [vmem:[%s2300_s0 + $0x78] sm:$0xff]  ;;  %v43_v33 = vld [vmem:[%s2300_s0 + $0x88] sm:$0xff] }
   0x7   :  { %75 = vadd.xlane.f32.xlu1 %v74_v6  ;;  %v101_v31 = vsel %vm58_vm0, %v40_v29, 0.0  ;;  %v104_v34 = vsel %vm58_vm0, %v41_v32, 0.0  ;;  %v110_v35 = vsel %vm58_vm0, %v43_v33, 0.0  ;;  %v46_v36 = vld [vmem:[%s2300_s0 + $0xa0] sm:$0xff]  ;;  %v44_v37 = vld [vmem:[%s2300_s0 + $0x90] sm:$0xff]  ;;  %v45_v40 = vld [vmem:[%s2300_s0 + $0x98] sm:$0xff] }
   0x8   :  { %63 = vadd.xlane.f32.xlu0 %v62_v7  ;;  %v119_v38 = vsel %vm58_vm0, %v46_v36, 0.0  ;;  %v113_v39 = vsel %vm58_vm0, %v44_v37, 0.0  ;;  %v47_v41 = vld [vmem:[%s2300_s0 + $0xa8] sm:$0xff]  ;;  %v116_v42 = vsel %vm58_vm0, %v45_v40, 0.0  ;;  %v50_v44 = vld [vmem:[%s2300_s0 + $0xc0] sm:$0xff]  ;;  %v48_v45 = vld [vmem:[%s2300_s0 + $0xb0] sm:$0xff] }
   0x9   :  { %v122_v43 = vsel %vm58_vm0, %v47_v41, 0.0  ;;  %v131_v46 = vsel %vm58_vm0, %v50_v44, 0.0  ;;  %v125_v47 = vsel %vm58_vm0, %v48_v45, 0.0  ;;  %v49_v48 = vld [vmem:[%s2300_s0 + $0xb8] sm:$0xff]  ;;  %v51_v49 = vld [vmem:[%s2300_s0 + $0xc8] sm:$0xff]  ;;  %v54_v52 = vld [vmem:[%s2300_s0 + $0xe0] sm:$0xff] }
   0xa   :  { %v128_v50 = vsel %vm58_vm0, %v49_v48, 0.0  ;;  %v134_v51 = vsel %vm58_vm0, %v51_v49, 0.0  ;;  %v52_v53 = vld [vmem:[%s2300_s0 + $0xd0] sm:$0xff]  ;;  %v143_v54 = vsel %vm58_vm0, %v54_v52, 0.0  ;;  %v53_v56 = vld [vmem:[%s2300_s0 + $0xd8] sm:$0xff]  ;;  %v55_v57 = vld [vmem:[%s2300_s0 + $0xe8] sm:$0xff] }
   0xb   :  { %78 = vadd.xlane.f32.xlu1 %v77_v10  ;;  %v137_v55 = vsel %vm58_vm0, %v52_v53, 0.0  ;;  %v140_v58 = vsel %vm58_vm0, %v53_v56, 0.0  ;;  %v146_v59 = vsel %vm58_vm0, %v55_v57, 0.0  ;;  %v56_v60 = vld [vmem:[%s2300_s0 + $0xf0] sm:$0xff]  ;;  %v57_v61 = vld [vmem:[%s2300_s0 + $0xf8] sm:$0xff]  ;;  %v155_v0 = vld [vmem:[%s2301_s1] sm:$0xff] }
   0xc   :  { %66 = vadd.xlane.f32.xlu0 %v65_v11  ;;  %v149_v62 = vsel %vm58_vm0, %v56_v60, 0.0  ;;  %v152_v63 = vsel %vm58_vm0, %v57_v61, 0.0  ;;  %v156_v1 = vld [vmem:[%s2301_s1 + $0x20] sm:$0xff]  ;;  %v1802_v3 = vmov 0.0|0.0   ;;  %v1804_v7 = vmov 0.0   ;;  %v441_v8 = vld [vmem:[%s2301_s1 + $0x10] sm:$0xff] }
   0xd   :  { %v1467_v2 = vpack.c.bf16 %v156_v1, %v155_v0  ;;  %1466 = vmatprep.subr.bf16.mxu0 %v1802_v3  ;;  %v157_v4 = vld [vmem:[%s2301_s1 + $0x40] sm:$0xff]  ;;  %1452 = vmatprep.mubr.msk.f32.mxu0 %vm1803_vm1, %v1804_v7  ;;  %v444_v9 = vld [vmem:[%s2301_s1 + $0x30] sm:$0xff]  ;;  %vm356_vm7 = vcmask 1043459   ;;  %vm358_vm8 = vcmask 1044484   ;;  %vm360_vm9 = vcmask 1045509   ;;  %s22_s8 = sshll.u32 %s1805_s7, 4  ;;  %s23_s8 = int_to_ptr.vmem [resolvable:$true] %s22_s8 }
   0xe   :  { %v158_v5 = vld [vmem:[%s2301_s1 + $0x60] sm:$0xff]  ;;  %v1472_v10 = vpack.c.bf16 %v444_v9, %v441_v8  ;;  %vm362_vm10 = vcmask 1046534   ;;  %vm364_vm11 = vcmask 1047559   ;;  %vm366_vm12 = vcmask 261120   ;;  %s1778_s11 = scalar_lea.hbm %s2302_s3, 32768 }
   0xf   :  { %87 = vadd.xlane.f32.xlu1 %v86_v14  ;;  %1468 = vmatpush3.bf16.msra.mxu0 %v1467_v2  ;;  %v1470_v6 = vpack.c.bf16 %v158_v5, %v157_v4  ;;  %p1779_p0 = scmp.ne.s32.totalorder %s2302_s3, %s1778_s11  ;;  %p1782_p1 = scmp.lt.u32.totalorder %s1778_s11, %s2302_s3 }
  0x10   :  { %84 = vadd.xlane.f32.xlu0 %v83_v15  ;;  %1469 = vmatprep.subr.bf16.mxu0 %v1802_v3 }
  0x11   :  { %p1784_p2 = pnand %p1782_p1, %p1779_p0 }
  0x13   :  { %81 = vadd.xlane.f32.xlu1 %v80_v18  ;;  %1471 = vmatpush3.bf16.msra.mxu0 %v1470_v6 }
  0x14   :  { %69 = vadd.xlane.f32.xlu0 %v68_v19  ;;  %1473 = vmatprep.subr.bf16.mxu0 %v1472_v10 }
  0x17   :  { %96 = vadd.xlane.f32.xlu1 %v95_v22 }
  0x18   :  { %90 = vadd.xlane.f32.xlu0 %v89_v23 }
  0x1b   :  { %93 = vadd.xlane.f32.xlu1 %v92_v26 }
  0x1c   :  { %99 = vadd.xlane.f32.xlu0 %v98_v27  ;;  %v192_v27 = vlaneseq }
  0x1f   :  { %108 = vadd.xlane.f32.xlu1 %v107_v30  ;;  %v193_v30 = vand.u32 127, %v192_v27 }
  0x20   :  { %102 = vadd.xlane.f32.xlu0 %v101_v31 }
  0x21   :  { %v198_v33 = vadd.s32 4294967288, %v193_v30  ;;  %v212_v36 = vadd.s32 4294967272, %v193_v30 }
  0x23   :  { %105 = vadd.xlane.f32.xlu1 %v104_v34  ;;  %v1997_v34 = vshrl.u32 %v192_v27, 7 }
  0x24   :  { %111 = vadd.xlane.f32.xlu0 %v110_v35  ;;  %v205_v35 = vadd.s32 4294967280, %v193_v30 }
  0x25   :  { %v2007_v40 = vsub.s32 %v193_v30, %v1997_v34 }
  0x26   :  { %v2010_v41 = vsub.s32 %v205_v35, %v1997_v34 }
  0x27   :  { %120 = vadd.xlane.f32.xlu1 %v119_v38 }
  0x28   :  { %114 = vadd.xlane.f32.xlu0 %v113_v39  ;;  %v2004_v39 = vsub.s32 %v198_v33, %v1997_v34 }
  0x2b   :  { %117 = vadd.xlane.f32.xlu1 %v116_v42  ;;  %v2013_v42 = vsub.s32 %v212_v36, %v1997_v34 }
  0x2c   :  { %123 = vadd.xlane.f32.xlu0 %v122_v43 }
  0x2f   :  { %132 = vadd.xlane.f32.xlu1 %v131_v46 }
  0x30   :  { %126 = vadd.xlane.f32.xlu0 %v125_v47 }
  0x33   :  { %129 = vadd.xlane.f32.xlu1 %v128_v50 }
  0x34   :  { %135 = vadd.xlane.f32.xlu0 %v134_v51 }
  0x37   :  { %144 = vadd.xlane.f32.xlu1 %v143_v54 }
  0x38   :  { %138 = vadd.xlane.f32.xlu0 %v137_v55 }
  0x3b   :  { %141 = vadd.xlane.f32.xlu1 %v140_v58 }
  0x3c   :  { %147 = vadd.xlane.f32.xlu0 %v146_v59 }
  0x3f   :  { %153 = vadd.xlane.f32.xlu1 %v152_v63 }
  0x40   :  { %150 = vadd.xlane.f32.xlu0 %v149_v62 }
  0x90   :  { %v73_v11 = vpop.xlane.xlu1 %72 }
  0x91   :  { %v61_v12 = vpop.xlane.xlu0 %60  ;;  %v222_v47 = vrot.slane %v73_v11, %v2007_v40 }
  0x92   :  { %v197_v48 = vrot.slane %v61_v12, %v2007_v40 }
  0x94   :  { %v76_v13 = vpop.xlane.xlu1 %75 }
  0x95   :  { %v64_v14 = vpop.xlane.xlu0 %63  ;;  %v226_v45 = vrot.slane %v76_v13, %v2004_v39 }
  0x96   :  { %v202_v46 = vrot.slane %v64_v14, %v2004_v39 }
  0x97   :  { %v227_v58 = vsel %vm203_vm2, %v226_v45, %v222_v47 }
  0x98   :  { %v79_v15 = vpop.xlane.xlu1 %78  ;;  %v204_v59 = vsel %vm203_vm2, %v202_v46, %v197_v48  ;;  %v443_v48 = vld [vmem:[%s2301_s1 + $0x28] sm:$0xff] }
  0x99   :  { %v67_v16 = vpop.xlane.xlu0 %66  ;;  %v231_v49 = vrot.slane %v79_v15, %v2010_v41 }
  0x9a   :  { %v209_v50 = vrot.slane %v67_v16, %v2010_v41 }
  0x9b   :  { %v232_v61 = vsel %vm210_vm3, %v231_v49, %v227_v58 }
  0x9c   :  { %v88_v17 = vpop.xlane.xlu1 %87  ;;  %v211_v62 = vsel %vm210_vm3, %v209_v50, %v204_v59 }
  0x9d   :  { %v85_v18 = vpop.xlane.xlu0 %84  ;;  %v245_v51 = vrot.slane %v88_v17, %v2004_v39 }
  0x9e   :  { %v241_v52 = vrot.slane %v85_v18, %v2007_v40 }
  0xa0   :  { %v82_v19 = vpop.xlane.xlu1 %81  ;;  %v246_v63 = vsel %vm203_vm2, %v245_v51, %v241_v52 }
  0xa1   :  { %v70_v20 = vpop.xlane.xlu0 %69  ;;  %v236_v53 = vrot.slane %v82_v19, %v2013_v42 }
  0xa2   :  { %v216_v54 = vrot.slane %v70_v20, %v2013_v42 }
  0xa3   :  { %v237_v0 = vsel %vm217_vm4, %v236_v53, %v232_v61  ;;  %v446_v61 = vld [vmem:[%s2301_s1 + $0x48] sm:$0xff] }
  0xa4   :  { %v1981_v21 = vpop.xlane.xlu1 %96  ;;  %v218_v1 = vsel %vm217_vm4, %v216_v54, %v211_v62  ;;  %v449_v62 = vld [vmem:[%s2301_s1 + $0x68] sm:$0xff] }
  0xa5   :  { %v91_v22 = vpop.xlane.xlu0 %90  ;;  %v260_v6 = vrot.slane %v1981_v21, %v2007_v40  ;;  %v353_v33 = vsel %vm352_vm5, %v237_v0, %v218_v1  ;;  %v159_v0 = vld [vmem:[%s2301_s1 + $0x80] ss:$0 sm:$0xff]  ;;  %v442_v1 = vld [vmem:[%s2301_s1 + $0x18] sm:$0xff] }
  0xa6   :  { %v250_v57 = vrot.slane %v91_v22, %v2010_v41 }
  0xa8   :  { %v94_v23 = vpop.xlane.xlu1 %93  ;;  %v251_v8 = vsel %vm210_vm3, %v250_v57, %v246_v63  ;;  %v1478_v63 = vpack.c.bf16 %v449_v62, %v446_v61 }
  0xa9   :  { %v1983_v24 = vpop.xlane.xlu0 %99  ;;  %v255_v60 = vrot.slane %v94_v23, %v2013_v42 }
  0xaa   :  { %v264_v2 = vrot.slane %v1983_v24, %v2004_v39 }
  0xab   :  { %v256_v11 = vsel %vm217_vm4, %v255_v60, %v251_v8 }
  0xac   :  { %v1985_v25 = vpop.xlane.xlu1 %108  ;;  %v265_v19 = vsel %vm203_vm2, %v264_v2, %v260_v6  ;;  %v445_v2 = vld [vmem:[%s2301_s1 + $0x38] sm:$0xff] }
  0xad   :  { %v1987_v26 = vpop.xlane.xlu0 %102  ;;  %v279_v15 = vrot.slane %v1985_v25, %v2007_v40  ;;  %v1481_v8 = vpack.c.bf16 %v445_v2, %v442_v1 }
  0xae   :  { %v269_v9 = vrot.slane %v1987_v26, %v2010_v41 }
  0xb0   :  { %v1989_v28 = vpop.xlane.xlu1 %105  ;;  %v270_v25 = vsel %vm210_vm3, %v269_v9, %v265_v19 }
  0xb1   :  { %v1991_v29 = vpop.xlane.xlu0 %111  ;;  %v274_v12 = vrot.slane %v1989_v28, %v2013_v42 }
  0xb2   :  { %v283_v10 = vrot.slane %v1991_v29, %v2004_v39 }
  0xb3   :  { %v275_v29 = vsel %vm217_vm4, %v274_v12, %v270_v25 }
  0xb4   :  { %v1993_v31 = vpop.xlane.xlu1 %120  ;;  %v284_v26 = vsel %vm203_vm2, %v283_v10, %v279_v15  ;;  %v448_v10 = vld [vmem:[%s2301_s1 + $0x58] sm:$0xff] }
  0xb5   :  { %v1995_v32 = vpop.xlane.xlu0 %114  ;;  %v298_v20 = vrot.slane %v1993_v31, %v2007_v40 }
  0xb6   :  { %v288_v13 = vrot.slane %v1995_v32, %v2010_v41 }
  0xb8   :  { %v1999_v37 = vpop.xlane.xlu1 %117  ;;  %v289_v30 = vsel %vm210_vm3, %v288_v13, %v284_v26 }
  0xb9   :  { %v2001_v38 = vpop.xlane.xlu0 %123  ;;  %v293_v16 = vrot.slane %v1999_v37, %v2013_v42 }
  0xba   :  { %v302_v14 = vrot.slane %v2001_v38, %v2004_v39  ;;  %v355_v38 = vsel %vm354_vm6, %v256_v11, %v353_v33  ;;  %v451_v11 = vld [vmem:[%s2301_s1 + $0x78] sm:$0xff] }
  0xbb   :  { %v294_v35 = vsel %vm217_vm4, %v293_v16, %v289_v30  ;;  %v357_v49 = vsel %vm356_vm7, %v275_v29, %v355_v38  ;;  %v1484_v12 = vpack.c.bf16 %v451_v11, %v448_v10 }
  0xbc   :  { %v2015_v43 = vpop.xlane.xlu1 %132  ;;  %v303_v31 = vsel %vm203_vm2, %v302_v14, %v298_v20  ;;  %v359_v52 = vsel %vm358_vm8, %v294_v35, %v357_v49 }
  0xbd   :  { %v2017_v44 = vpop.xlane.xlu0 %126  ;;  %v317_v27 = vrot.slane %v2015_v43, %v2007_v40 }
  0xbe   :  { %v307_v17 = vrot.slane %v2017_v44, %v2010_v41 }
  0xc0   :  { %v130_v55 = vpop.xlane.xlu1 %129  ;;  %v308_v36 = vsel %vm210_vm3, %v307_v17, %v303_v31 }
  0xc1   :  { %v136_v56 = vpop.xlane.xlu0 %135  ;;  %v312_v21 = vrot.slane %v130_v55, %v2013_v42 }
  0xc2   :  { %v321_v18 = vrot.slane %v136_v56, %v2004_v39 }
  0xc3   :  { %v313_v43 = vsel %vm217_vm4, %v312_v21, %v308_v36 }
  0xc4   :  { %v145_v4 = vpop.xlane.xlu1 %144  ;;  %v322_v37 = vsel %vm203_vm2, %v321_v18, %v317_v27  ;;  %v361_v54 = vsel %vm360_vm9, %v313_v43, %v359_v52 }
  0xc5   :  { %v139_v5 = vpop.xlane.xlu0 %138  ;;  %v336_v44 = vrot.slane %v145_v4, %v2007_v40 }
  0xc6   :  { %v326_v22 = vrot.slane %v139_v5, %v2010_v41 }
  0xc8   :  { %v142_v23 = vpop.xlane.xlu1 %141  ;;  %v327_v45 = vsel %vm210_vm3, %v326_v22, %v322_v37 }
  0xc9   :  { %v148_v24 = vpop.xlane.xlu0 %147  ;;  %v331_v28 = vrot.slane %v142_v23, %v2013_v42 }
  0xca   :  { %v340_v32 = vrot.slane %v148_v24, %v2004_v39  ;;  %v440_v39 = vld [vmem:[%s2301_s1 + $0x8] sm:$0xff] }
  0xcb   :  { %v332_v50 = vsel %vm217_vm4, %v331_v28, %v327_v45  ;;  %v1474_v56 = vpack.c.bf16 %v443_v48, %v440_v39 }
  0xcc   :  { %v154_v47 = vpop.xlane.xlu1 %153  ;;  %v341_v53 = vsel %vm203_vm2, %v340_v32, %v336_v44  ;;  %v363_v58 = vsel %vm362_vm10, %v332_v50, %v361_v54 }
  0xcd   :  { %v151_v46 = vpop.xlane.xlu0 %150  ;;  %v350_v40 = vrot.slane %v154_v47, %v2013_v42  ;;  %v450_v42 = vld [vmem:[%s2301_s1 + $0x70] sm:$0xff] }
  0xce   :  { %v345_v51 = vrot.slane %v151_v46, %v2010_v41  ;;  %v447_v41 = vld [vmem:[%s2301_s1 + $0x50] sm:$0xff] }
  0xcf   :  { %v1476_v60 = vpack.c.bf16 %v450_v42, %v447_v41 }
  0xd0   :  { %v346_v55 = vsel %vm210_vm3, %v345_v51, %v341_v53 }
  0xd1   :  { %v351_v57 = vsel %vm217_vm4, %v350_v40, %v346_v55 }
  0xd2   :  { %v365_v59 = vsel %vm364_vm11, %v351_v57, %v363_v58 }
  0xd3   :  { %1453 = vmatmul.mubr.msk.f32.vlgmr.msra.gmra.mrb[0].mxu0 %vm366_vm12, %v365_v59 }
  0xd4   :  { %1475 = vmatpush1.bf16.msra.mxu0 %v1474_v56  ;;  %537 = vmatprep.mubr.f32.mxu0 %v1804_v7 }
  0xd5   :  { %1477 = vmatprep.subr.bf16.mxu0 %v1476_v60 }
  0xd8   :  { %1479 = vmatpush1.bf16.msra.mxu0 %v1478_v63 }
  0xd9   :  { %1480 = vmatprep.subr.bf16.mxu0 %v1802_v3 }
 0x1a6   :  { %v435_v4 = vpop.f32.mrb[0].mxu0 }
 0x1a7   :  { %v436_v5 = vadd.f32 %v435_v4, %v159_v0  ;;  %v1454_v6 = vpop.f32.mrb[1].mxu0 }
 0x1a9   :  { %v439_v9 = vmax.f32 %v436_v5, 0.0 }
 0x1ab   :  { %1391 = vmatmul.mubr.msk.f32.vlgmr.msra.gmra.mrb[2].mxu0 %vm366_vm12, %v439_v9 }
 0x1ac   :  { %1482 = vmatpush3.bf16.msra.mxu0 %v1481_v8  ;;  %1463 = vmatprep.mubr.msk.f32.mxu0 %vm1803_vm1, %v1804_v7 }
 0x1ad   :  { %1483 = vmatprep.subr.bf16.mxu0 %v1802_v3 }
 0x1b0   :  { %1485 = vmatpush3.bf16.msra.mxu0 %v1484_v12 }
 0x1b3   :  { %1464 = vmatmul.mubr.msk.f32.vlgmr.msra.gmra.mrb[4].mxu0 %vm366_vm12, %v439_v9 }
 0x1b4   :  { %1787 = shalt.err (!%p1784_p2)  }
 0x1b5   :  { %s1788_s16 = scalar_lea.vmem %s23_s8, 32768  ;;  %p1793_p4 = scmp.lt.s32.totalorder %s23_s8, %s23_s8 }
 0x1b6   :  { %p1789_p3 = scmp.ne.s32.totalorder %s23_s8, %s1788_s16  ;;  %p1794_p5 = scmp.lt.s32.totalorder %s1788_s16, %s1788_s16 }
 0x1b8   :  { %p1795_p6 = por %p1794_p5, %p1793_p4 }
 0x1ba   :  { %p1796_p7 = pnand %p1795_p6, %p1789_p3 }
 0x1bc   :  { %1799 = shalt.err (!%p1796_p7)  }
 0x1bd   :  { %25 = dma.hbm_to_vmem [thread:$0]  %s2302_s3, 32768, %s23_s8, [#allocation3]  ;;  %v2147_v3 = vsub.s32 0, %v1997_v34  ;;  %v1390_v7 = vld [vmem:[%s2301_s1 + $0x88] ss:$8 sm:$0x7] }
 0x1be   :  { %v2154_v14 = vsub.s32 1, %v1997_v34  ;;  %v465_v19 = vsub.s32 2, %v1997_v34 }
 0x1bf   :  { %v458_v13 = vrot.slane %v1390_v7, %v2147_v3 }
 0x1c0   :  { %v462_v17 = vrot.slane %v1390_v7, %v2154_v14  ;;  %v466_v21 = vrot.slane %v1390_v7, %v465_v19 }
 0x27e   :  { %v539_v15 = vpop.f32.mrb[2].mxu0 }
 0x27f   :  { %v540_v16 = vadd.f32 %v539_v15, %v458_v13  ;;  %v541_v18 = vpop.f32.mrb[3].mxu0 }
 0x280   :  { %v542_v20 = vadd.f32 %v541_v18, %v462_v17 }
 0x281   :  { %632 = vst [vmem:[%s2304_s4 + $0x4] sm:$0x3] %v540_v16 }
 0x282   :  { %v616_v23 = vmul.f32 0.2, %v542_v20  ;;  %vm614_vm13 = vcmp.gt.f32.partialorder %v542_v20, 0.0 }
 0x284   :  { %v2161_v27 = vsel %vm614_vm13, %v542_v20, %v616_v23 }
 0x286   :  { %v610_v22 = vpop.f32.mrb[4].mxu0 }
 0x287   :  { %v611_v24 = vadd.f32 %v610_v22, %v466_v21  ;;  %v1465_v25 = vpop.f32.mrb[5].mxu0 }
 0x289   :  { %vm615_vm14 = vcmp.gt.f32.partialorder %v611_v24, 0.0  ;;  %v617_v26 = vmul.f32 0.2, %v611_v24 }
 0x28b   :  { %v2163_v28 = vsel %vm615_vm14, %v611_v24, %v617_v26 }
 0x28c   :  { %v622_v34 = vcombine.low %v2161_v27, %v2163_v28 }
 0x28e   :  { %1393 = vst.sshfl [vmem:[%s2304_s4] sm:$0x33 pattern:$0x76325410] %v622_v34 }
 0x28f   :  { %1800 = dma.done.wait [#allocation3], 32768 }
 0x290   :  { %1801 = vsyncadd [#allocation3], 4294934528  ;;  %779 = vmatprep.mubr.f32.mxu1 %v2163_v28  ;;  %v641_v29 = vld [vmem:[#allocation2 + $0x8] sm:$0xff]  ;;  %v643_v30 = vld [vmem:[#allocation2 + $0x18] sm:$0xff] }
 0x291   :  { %v640_v31 = vld [vmem:[#allocation2] sm:$0xff]  ;;  %v1486_v32 = vpack.c.bf16 %v643_v30, %v641_v29  ;;  %v642_v33 = vld [vmem:[#allocation2 + $0x10] sm:$0xff]  ;;  %v645_v35 = vld [vmem:[#allocation2 + $0x28] sm:$0xff] }
 0x292   :  { %v647_v36 = vld [vmem:[#allocation2 + $0x38] sm:$0xff]  ;;  %v1488_v37 = vpack.c.bf16 %v642_v33, %v640_v31  ;;  %v644_v43 = vld [vmem:[#allocation2 + $0x20] sm:$0xff]  ;;  %v646_v44 = vld [vmem:[#allocation2 + $0x30] sm:$0xff] }
 0x293   :  { %v1490_v38 = vpack.c.bf16 %v647_v36, %v645_v35  ;;  %v649_v45 = vld [vmem:[#allocation2 + $0x48] sm:$0xff]  ;;  %1487 = vmatprep.subr.bf16.mxu1 %v1486_v32  ;;  %v651_v46 = vld [vmem:[#allocation2 + $0x58] sm:$0xff]  ;;  %v1492_v47 = vpack.c.bf16 %v646_v44, %v644_v43  ;;  %v648_v48 = vld [vmem:[#allocation2 + $0x40] sm:$0xff] }
 0x294   :  { %1489 = vmatpush1.bf16.msra.mxu1 %v1488_v37  ;;  %v1494_v39 = vpack.c.bf16 %v651_v46, %v649_v45  ;;  %v650_v49 = vld [vmem:[#allocation2 + $0x50] sm:$0xff]  ;;  %v653_v50 = vld [vmem:[#allocation2 + $0x68] sm:$0xff]  ;;  %v655_v51 = vld [vmem:[#allocation2 + $0x78] sm:$0xff] }
 0x295   :  { %1491 = vmatprep.subr.bf16.mxu1 %v1490_v38  ;;  %v1496_v40 = vpack.c.bf16 %v650_v49, %v648_v48  ;;  %v1498_v52 = vpack.c.bf16 %v655_v51, %v653_v50  ;;  %v652_v53 = vld [vmem:[#allocation2 + $0x60] sm:$0xff]  ;;  %v654_v54 = vld [vmem:[#allocation2 + $0x70] sm:$0xff]  ;;  %v657_v55 = vld [vmem:[#allocation2 + $0x88] sm:$0xff] }
 0x296   :  { %v659_v56 = vld [vmem:[#allocation2 + $0x98] sm:$0xff]  ;;  %v1500_v57 = vpack.c.bf16 %v654_v54, %v652_v53  ;;  %v656_v59 = vld [vmem:[#allocation2 + $0x80] sm:$0xff]  ;;  %v658_v41 = vld [vmem:[#allocation2 + $0x90] sm:$0xff] }
 0x297   :  { %v1502_v58 = vpack.c.bf16 %v659_v56, %v657_v55  ;;  %v661_v42 = vld [vmem:[#allocation2 + $0xa8] sm:$0xff]  ;;  %v663_v60 = vld [vmem:[#allocation2 + $0xb8] sm:$0xff]  ;;  %v1504_v61 = vpack.c.bf16 %v658_v41, %v656_v59  ;;  %v660_v63 = vld [vmem:[#allocation2 + $0xa0] sm:$0xff] }
 0x298   :  { %1493 = vmatpush1.bf16.msra.mxu1 %v1492_v47  ;;  %v1506_v62 = vpack.c.bf16 %v663_v60, %v661_v42  ;;  %v662_v0 = vld [vmem:[#allocation2 + $0xb0] sm:$0xff]  ;;  %v665_v1 = vld [vmem:[#allocation2 + $0xc8] sm:$0xff]  ;;  %v667_v2 = vld [vmem:[#allocation2 + $0xd8] sm:$0xff] }
 0x299   :  { %1495 = vmatprep.subr.bf16.mxu1 %v1494_v39  ;;  %v1508_v4 = vpack.c.bf16 %v662_v0, %v660_v63  ;;  %v664_v5 = vld [vmem:[#allocation2 + $0xc0] sm:$0xff]  ;;  %v666_v6 = vld [vmem:[#allocation2 + $0xd0] sm:$0xff]  ;;  %v669_v8 = vld [vmem:[#allocation2 + $0xe8] sm:$0xff]  ;;  %v1510_v9 = vpack.c.bf16 %v667_v2, %v665_v1 }
 0x29a   :  { %v671_v10 = vld [vmem:[#allocation2 + $0xf8] sm:$0xff]  ;;  %v802_v11 = vld [vmem:[#allocation2 + $0x208] sm:$0xff]  ;;  %v801_v13 = vld [vmem:[#allocation2 + $0x200] sm:$0xff]  ;;  %v1512_v21 = vpack.c.bf16 %v666_v6, %v664_v5 }
 0x29b   :  { %v804_v12 = vld [vmem:[#allocation2 + $0x218] sm:$0xff]  ;;  %v803_v15 = vld [vmem:[#allocation2 + $0x210] sm:$0xff]  ;;  %v806_v16 = vld [vmem:[#allocation2 + $0x228] sm:$0xff]  ;;  %v1514_v25 = vpack.c.bf16 %v671_v10, %v669_v8 }
 0x29c   :  { %1497 = vmatpush1.bf16.msra.mxu1 %v1496_v40  ;;  %v1550_v7 = vpack.c.bf16 %v804_v12, %v802_v11  ;;  %v1552_v17 = vpack.c.bf16 %v803_v15, %v801_v13  ;;  %v808_v18 = vld [vmem:[#allocation2 + $0x238] sm:$0xff]  ;;  %v805_v19 = vld [vmem:[#allocation2 + $0x220] sm:$0xff]  ;;  %v807_v20 = vld [vmem:[#allocation2 + $0x230] sm:$0xff] }
 0x29d   :  { %1499 = vmatprep.subr.bf16.mxu1 %v1498_v52  ;;  %v1554_v22 = vpack.c.bf16 %v808_v18, %v806_v16  ;;  %v810_v23 = vld [vmem:[#allocation2 + $0x248] sm:$0xff]  ;;  %v812_v24 = vld [vmem:[#allocation2 + $0x258] sm:$0xff]  ;;  %v668_v26 = vld [vmem:[#allocation2 + $0xe0] sm:$0xff]  ;;  %v1556_v30 = vpack.c.bf16 %v807_v20, %v805_v19 }
 0x29e   :  { %1551 = vmatprep.subr.bf16.mxu0 %v1550_v7  ;;  %v670_v34 = vld [vmem:[#allocation2 + $0xf0] sm:$0xff]  ;;  %v673_v29 = vld [vmem:[#allocation2 + $0x108] sm:$0xff]  ;;  %v675_v31 = vld [vmem:[#allocation2 + $0x118] sm:$0xff]  ;;  %v1558_v32 = vpack.c.bf16 %v812_v24, %v810_v23 }
 0x29f   :  { %1553 = vmatpush1.bf16.msra.mxu0 %v1552_v17  ;;  %v809_v33 = vld [vmem:[#allocation2 + $0x240] sm:$0xff]  ;;  %v811_v35 = vld [vmem:[#allocation2 + $0x250] sm:$0xff]  ;;  %v814_v36 = vld [vmem:[#allocation2 + $0x268] sm:$0xff]  ;;  %v1516_v38 = vpack.c.bf16 %v670_v34, %v668_v26  ;;  %v1518_v43 = vpack.c.bf16 %v675_v31, %v673_v29 }
 0x2a0   :  { %1501 = vmatpush1.bf16.msra.mxu1 %v1500_v57  ;;  %1555 = vmatprep.subr.bf16.mxu0 %v1554_v22  ;;  %v816_v37 = vld [vmem:[#allocation2 + $0x278] sm:$0xff]  ;;  %v672_v44 = vld [vmem:[#allocation2 + $0x100] sm:$0xff]  ;;  %v674_v45 = vld [vmem:[#allocation2 + $0x110] sm:$0xff]  ;;  %v1560_v47 = vpack.c.bf16 %v811_v35, %v809_v33 }
 0x2a1   :  { %1503 = vmatprep.subr.bf16.mxu1 %v1502_v58  ;;  %v677_v46 = vld [vmem:[#allocation2 + $0x128] sm:$0xff]  ;;  %v679_v39 = vld [vmem:[#allocation2 + $0x138] sm:$0xff]  ;;  %v1562_v48 = vpack.c.bf16 %v816_v37, %v814_v36  ;;  %v813_v49 = vld [vmem:[#allocation2 + $0x260] sm:$0xff]  ;;  %v1520_v52 = vpack.c.bf16 %v674_v45, %v672_v44 }
 0x2a2   :  { %v815_v50 = vld [vmem:[#allocation2 + $0x270] sm:$0xff]  ;;  %v818_v51 = vld [vmem:[#allocation2 + $0x288] sm:$0xff]  ;;  %v820_v40 = vld [vmem:[#allocation2 + $0x298] sm:$0xff]  ;;  %v1522_v53 = vpack.c.bf16 %v679_v39, %v677_v46 }
 0x2a3   :  { %1557 = vmatpush1.bf16.msra.mxu0 %v1556_v30  ;;  %v676_v54 = vld [vmem:[#allocation2 + $0x120] sm:$0xff]  ;;  %v678_v55 = vld [vmem:[#allocation2 + $0x130] sm:$0xff]  ;;  %v681_v56 = vld [vmem:[#allocation2 + $0x148] sm:$0xff]  ;;  %v1564_v57 = vpack.c.bf16 %v815_v50, %v813_v49  ;;  %v1566_v59 = vpack.c.bf16 %v820_v40, %v818_v51 }
 0x2a4   :  { %1505 = vmatpush1.bf16.msra.mxu1 %v1504_v61  ;;  %1559 = vmatprep.subr.bf16.mxu0 %v1558_v32  ;;  %v683_v58 = vld [vmem:[#allocation2 + $0x158] sm:$0xff]  ;;  %v817_v41 = vld [vmem:[#allocation2 + $0x280] sm:$0xff]  ;;  %v819_v42 = vld [vmem:[#allocation2 + $0x290] sm:$0xff] }
 0x2a5   :  { %1507 = vmatprep.subr.bf16.mxu1 %v1506_v62  ;;  %v822_v60 = vld [vmem:[#allocation2 + $0x2a8] sm:$0xff]  ;;  %v824_v61 = vld [vmem:[#allocation2 + $0x2b8] sm:$0xff]  ;;  %v1524_v62 = vpack.c.bf16 %v678_v55, %v676_v54  ;;  %v1526_v63 = vpack.c.bf16 %v683_v58, %v681_v56  ;;  %v680_v0 = vld [vmem:[#allocation2 + $0x140] sm:$0xff] }
 0x2a6   :  { %v682_v1 = vld [vmem:[#allocation2 + $0x150] sm:$0xff]  ;;  %v685_v2 = vld [vmem:[#allocation2 + $0x168] sm:$0xff]  ;;  %v687_v5 = vld [vmem:[#allocation2 + $0x178] sm:$0xff]  ;;  %v1570_v6 = vpack.c.bf16 %v824_v61, %v822_v60 }
 0x2a7   :  { %1561 = vmatpush1.bf16.msra.mxu0 %v1560_v47  ;;  %v821_v8 = vld [vmem:[#allocation2 + $0x2a0] sm:$0xff]  ;;  %v826_v10 = vld [vmem:[#allocation2 + $0x2c8] sm:$0xff]  ;;  %v828_v11 = vld [vmem:[#allocation2 + $0x2d8] sm:$0xff]  ;;  %v1528_v12 = vpack.c.bf16 %v682_v1, %v680_v0  ;;  %v1530_v7 = vpack.c.bf16 %v687_v5, %v685_v2 }
 0x2a8   :  { %1509 = vmatpush1.bf16.msra.mxu1 %v1508_v4  ;;  %1563 = vmatprep.subr.bf16.mxu0 %v1562_v48  ;;  %v1568_v4 = vpack.c.bf16 %v819_v42, %v817_v41  ;;  %v684_v13 = vld [vmem:[#allocation2 + $0x160] sm:$0xff]  ;;  %v686_v15 = vld [vmem:[#allocation2 + $0x170] sm:$0xff]  ;;  %v689_v16 = vld [vmem:[#allocation2 + $0x188] sm:$0xff]  ;;  %v1574_v19 = vpack.c.bf16 %v828_v11, %v826_v10 }
 0x2a9   :  { %1511 = vmatprep.subr.bf16.mxu1 %v1510_v9  ;;  %v823_v9 = vld [vmem:[#allocation2 + $0x2b0] sm:$0xff]  ;;  %v691_v18 = vld [vmem:[#allocation2 + $0x198] sm:$0xff]  ;;  %v825_v20 = vld [vmem:[#allocation2 + $0x2c0] sm:$0xff]  ;;  %v1532_v24 = vpack.c.bf16 %v686_v15, %v684_v13 }
 0x2aa   :  { %v1572_v17 = vpack.c.bf16 %v823_v9, %v821_v8  ;;  %v830_v22 = vld [vmem:[#allocation2 + $0x2e8] sm:$0xff]  ;;  %v832_v23 = vld [vmem:[#allocation2 + $0x2f8] sm:$0xff]  ;;  %v688_v26 = vld [vmem:[#allocation2 + $0x180] sm:$0xff] }
 0x2ab   :  { %1565 = vmatpush1.bf16.msra.mxu0 %v1564_v57  ;;  %v690_v34 = vld [vmem:[#allocation2 + $0x190] sm:$0xff]  ;;  %v693_v29 = vld [vmem:[#allocation2 + $0x1a8] sm:$0xff]  ;;  %v695_v31 = vld [vmem:[#allocation2 + $0x1b8] sm:$0xff]  ;;  %v1578_v32 = vpack.c.bf16 %v832_v23, %v830_v22 }
 0x2ac   :  { %1513 = vmatpush1.bf16.msra.mxu1 %v1512_v21  ;;  %1567 = vmatprep.subr.bf16.mxu0 %v1566_v59  ;;  %v827_v21 = vld [vmem:[#allocation2 + $0x2d0] sm:$0xff]  ;;  %v829_v33 = vld [vmem:[#allocation2 + $0x2e0] sm:$0xff]  ;;  %v834_v36 = vld [vmem:[#allocation2 + $0x308] sm:$0xff] }
 0x2ad   :  { %1515 = vmatprep.subr.bf16.mxu1 %v1514_v25  ;;  %v1534_v25 = vpack.c.bf16 %v691_v18, %v689_v16  ;;  %v1576_v30 = vpack.c.bf16 %v827_v21, %v825_v20  ;;  %v831_v35 = vld [vmem:[#allocation2 + $0x2f0] sm:$0xff]  ;;  %v836_v37 = vld [vmem:[#allocation2 + $0x318] sm:$0xff]  ;;  %v692_v44 = vld [vmem:[#allocation2 + $0x1a0] sm:$0xff] }
 0x2ae   :  { %v694_v45 = vld [vmem:[#allocation2 + $0x1b0] sm:$0xff]  ;;  %v697_v46 = vld [vmem:[#allocation2 + $0x1c8] sm:$0xff]  ;;  %v1580_v47 = vpack.c.bf16 %v831_v35, %v829_v33  ;;  %v699_v39 = vld [vmem:[#allocation2 + $0x1d8] sm:$0xff]  ;;  %v1582_v48 = vpack.c.bf16 %v836_v37, %v834_v36 }
 0x2af   :  { %1569 = vmatpush1.bf16.msra.mxu0 %v1568_v4  ;;  %v833_v49 = vld [vmem:[#allocation2 + $0x300] sm:$0xff]  ;;  %v835_v50 = vld [vmem:[#allocation2 + $0x310] sm:$0xff]  ;;  %v838_v51 = vld [vmem:[#allocation2 + $0x328] sm:$0xff] }
 0x2b0   :  { %1517 = vmatpush1.bf16.msra.mxu1 %v1516_v38  ;;  %1571 = vmatprep.subr.bf16.mxu0 %v1570_v6  ;;  %v1536_v38 = vpack.c.bf16 %v690_v34, %v688_v26  ;;  %v840_v40 = vld [vmem:[#allocation2 + $0x338] sm:$0xff]  ;;  %v696_v54 = vld [vmem:[#allocation2 + $0x1c0] sm:$0xff]  ;;  %v698_v55 = vld [vmem:[#allocation2 + $0x1d0] sm:$0xff]  ;;  %v1584_v57 = vpack.c.bf16 %v835_v50, %v833_v49 }
 0x2b1   :  { %1519 = vmatprep.subr.bf16.mxu1 %v1518_v43  ;;  %v1538_v43 = vpack.c.bf16 %v695_v31, %v693_v29  ;;  %v701_v56 = vld [vmem:[#allocation2 + $0x1e8] sm:$0xff]  ;;  %v703_v58 = vld [vmem:[#allocation2 + $0x1f8] sm:$0xff]  ;;  %v1586_v59 = vpack.c.bf16 %v840_v40, %v838_v51  ;;  %v837_v41 = vld [vmem:[#allocation2 + $0x320] sm:$0xff] }
 0x2b2   :  { %v839_v42 = vld [vmem:[#allocation2 + $0x330] sm:$0xff]  ;;  %v842_v60 = vld [vmem:[#allocation2 + $0x348] sm:$0xff]  ;;  %v844_v61 = vld [vmem:[#allocation2 + $0x358] sm:$0xff] }
 0x2b3   :  { %1573 = vmatpush1.bf16.msra.mxu0 %v1572_v17  ;;  %v700_v0 = vld [vmem:[#allocation2 + $0x1e0] sm:$0xff]  ;;  %v702_v1 = vld [vmem:[#allocation2 + $0x1f0] sm:$0xff]  ;;  %v1588_v2 = vpack.c.bf16 %v839_v42, %v837_v41  ;;  %v1590_v4 = vpack.c.bf16 %v844_v61, %v842_v60  ;;  %v846_v8 = vld [vmem:[#allocation2 + $0x368] sm:$0xff] }
 0x2b4   :  { %1521 = vmatpush1.bf16.msra.mxu1 %v1520_v52  ;;  %1575 = vmatprep.subr.bf16.mxu0 %v1574_v19  ;;  %v1540_v52 = vpack.c.bf16 %v694_v45, %v692_v44  ;;  %v841_v5 = vld [vmem:[#allocation2 + $0x340] sm:$0xff]  ;;  %v843_v6 = vld [vmem:[#allocation2 + $0x350] sm:$0xff]  ;;  %v848_v9 = vld [vmem:[#allocation2 + $0x378] sm:$0xff]  ;;  %v1548_v10 = vpack.c.bf16 %v702_v1, %v700_v0 }
 0x2b5   :  { %1523 = vmatprep.subr.bf16.mxu1 %v1522_v53  ;;  %v1542_v53 = vpack.c.bf16 %v699_v39, %v697_v46  ;;  %v1592_v11 = vpack.c.bf16 %v843_v6, %v841_v5  ;;  %v847_v13 = vld [vmem:[#allocation2 + $0x370] sm:$0xff]  ;;  %v850_v15 = vld [vmem:[#allocation2 + $0x388] sm:$0xff]  ;;  %v852_v16 = vld [vmem:[#allocation2 + $0x398] sm:$0xff] }
 0x2b6   :  { %v1598_v18 = vpack.c.bf16 %v852_v16, %v850_v15  ;;  %v849_v19 = vld [vmem:[#allocation2 + $0x380] sm:$0xff]  ;;  %v851_v20 = vld [vmem:[#allocation2 + $0x390] sm:$0xff]  ;;  %v854_v21 = vld [vmem:[#allocation2 + $0x3a8] sm:$0xff] }
 0x2b7   :  { %1577 = vmatpush1.bf16.msra.mxu0 %v1576_v30  ;;  %v856_v22 = vld [vmem:[#allocation2 + $0x3b8] sm:$0xff]  ;;  %v1600_v23 = vpack.c.bf16 %v851_v20, %v849_v19  ;;  %v855_v26 = vld [vmem:[#allocation2 + $0x3b0] sm:$0xff]  ;;  %v858_v29 = vld [vmem:[#allocation2 + $0x3c8] sm:$0xff] }
 0x2b8   :  { %1525 = vmatpush1.bf16.msra.mxu1 %v1524_v62  ;;  %1579 = vmatprep.subr.bf16.mxu0 %v1578_v32  ;;  %v1544_v62 = vpack.c.bf16 %v698_v55, %v696_v54  ;;  %v860_v30 = vld [vmem:[#allocation2 + $0x3d8] sm:$0xff]  ;;  %v857_v32 = vld [vmem:[#allocation2 + $0x3c0] sm:$0xff]  ;;  %v859_v33 = vld [vmem:[#allocation2 + $0x3d0] sm:$0xff] }
 0x2b9   :  { %1527 = vmatprep.subr.bf16.mxu1 %v1526_v63  ;;  %v1546_v63 = vpack.c.bf16 %v703_v58, %v701_v56  ;;  %v1606_v31 = vpack.c.bf16 %v860_v30, %v858_v29  ;;  %v1608_v35 = vpack.c.bf16 %v859_v33, %v857_v32  ;;  %v862_v36 = vld [vmem:[#allocation2 + $0x3e8] sm:$0xff]  ;;  %v864_v37 = vld [vmem:[#allocation2 + $0x3f8] sm:$0xff]  ;;  %v863_v44 = vld [vmem:[#allocation2 + $0x3f0] sm:$0xff] }
 0x2ba   :  { %v963_v46 = vld [vmem:[#allocation2 + $0x408] sm:$0xff]  ;;  %v962_v39 = vld [vmem:[#allocation2 + $0x400] sm:$0xff]  ;;  %v964_v49 = vld [vmem:[#allocation2 + $0x410] sm:$0xff] }
 0x2bb   :  { %1581 = vmatpush1.bf16.msra.mxu0 %v1580_v47  ;;  %v965_v47 = vld [vmem:[#allocation2 + $0x418] sm:$0xff]  ;;  %v967_v50 = vld [vmem:[#allocation2 + $0x428] sm:$0xff]  ;;  %v1616_v40 = vpack.c.bf16 %v964_v49, %v962_v39  ;;  %v968_v54 = vld [vmem:[#allocation2 + $0x430] sm:$0xff] }
 0x2bc   :  { %1529 = vmatpush1.bf16.msra.mxu1 %v1528_v12  ;;  %1583 = vmatprep.subr.bf16.mxu0 %v1582_v48  ;;  %v1594_v12 = vpack.c.bf16 %v848_v9, %v846_v8  ;;  %v1614_v48 = vpack.c.bf16 %v965_v47, %v963_v46  ;;  %v969_v51 = vld [vmem:[#allocation2 + $0x438] sm:$0xff]  ;;  %v971_v55 = vld [vmem:[#allocation2 + $0x448] sm:$0xff]  ;;  %v972_v41 = vld [vmem:[#allocation2 + $0x450] sm:$0xff] }
 0x2bd   :  { %1531 = vmatprep.subr.bf16.mxu1 %v1530_v7  ;;  %v845_v7 = vld [vmem:[#allocation2 + $0x360] sm:$0xff]  ;;  %v973_v56 = vld [vmem:[#allocation2 + $0x458] sm:$0xff]  ;;  %v975_v42 = vld [vmem:[#allocation2 + $0x468] sm:$0xff] }
 0x2be   :  { %v1596_v17 = vpack.c.bf16 %v847_v13, %v845_v7  ;;  %v1622_v58 = vpack.c.bf16 %v973_v56, %v971_v55  ;;  %v977_v60 = vld [vmem:[#allocation2 + $0x478] sm:$0xff]  ;;  %v976_v0 = vld [vmem:[#allocation2 + $0x470] sm:$0xff]  ;;  %v979_v1 = vld [vmem:[#allocation2 + $0x488] sm:$0xff] }
 0x2bf   :  { %1585 = vmatpush1.bf16.msra.mxu0 %v1584_v57  ;;  %v978_v6 = vld [vmem:[#allocation2 + $0x480] sm:$0xff]  ;;  %v980_v8 = vld [vmem:[#allocation2 + $0x490] sm:$0xff]  ;;  %v983_v9 = vld [vmem:[#allocation2 + $0x4a8] sm:$0xff] }
 0x2c0   :  { %1533 = vmatpush1.bf16.msra.mxu1 %v1532_v24  ;;  %1587 = vmatprep.subr.bf16.mxu0 %v1586_v59  ;;  %v1602_v24 = vpack.c.bf16 %v856_v22, %v854_v21  ;;  %v970_v59 = vld [vmem:[#allocation2 + $0x440] sm:$0xff]  ;;  %v984_v13 = vld [vmem:[#allocation2 + $0x4b0] sm:$0xff]  ;;  %v987_v15 = vld [vmem:[#allocation2 + $0x4c8] sm:$0xff] }
 0x2c1   :  { %1535 = vmatprep.subr.bf16.mxu1 %v1534_v25  ;;  %v853_v25 = vld [vmem:[#allocation2 + $0x3a0] sm:$0xff]  ;;  %v1624_v61 = vpack.c.bf16 %v972_v41, %v970_v59  ;;  %v989_v16 = vld [vmem:[#allocation2 + $0x4d8] sm:$0xff]  ;;  %v988_v20 = vld [vmem:[#allocation2 + $0x4d0] sm:$0xff] }
 0x2c2   :  { %v1604_v34 = vpack.c.bf16 %v855_v26, %v853_v25  ;;  %v982_v7 = vld [vmem:[#allocation2 + $0x4a0] sm:$0xff]  ;;  %v991_v21 = vld [vmem:[#allocation2 + $0x4e8] sm:$0xff]  ;;  %v993_v22 = vld [vmem:[#allocation2 + $0x4f8] sm:$0xff] }
 0x2c3   :  { %1589 = vmatpush1.bf16.msra.mxu0 %v1588_v2  ;;  %v981_v2 = vld [vmem:[#allocation2 + $0x498] sm:$0xff]  ;;  %v986_v19 = vld [vmem:[#allocation2 + $0x4c0] sm:$0xff]  ;;  %v992_v26 = vld [vmem:[#allocation2 + $0x4f0] sm:$0xff] }
 0x2c4   :  { %1537 = vmatpush1.bf16.msra.mxu1 %v1536_v38  ;;  %1591 = vmatprep.subr.bf16.mxu0 %v1590_v4  ;;  %v1610_v38 = vpack.c.bf16 %v864_v37, %v862_v36  ;;  %v1630_v5 = vpack.c.bf16 %v981_v2, %v979_v1  ;;  %v990_v25 = vld [vmem:[#allocation2 + $0x4e0] sm:$0xff]  ;;  %v997_v29 = vld [vmem:[#allocation2 + $0x518] sm:$0xff]  ;;  %v996_v33 = vld [vmem:[#allocation2 + $0x510] sm:$0xff] }
 0x2c5   :  { %1539 = vmatprep.subr.bf16.mxu1 %v1538_v43  ;;  %v861_v43 = vld [vmem:[#allocation2 + $0x3e0] sm:$0xff]  ;;  %v1644_v30 = vpack.c.bf16 %v992_v26, %v990_v25  ;;  %v1001_v36 = vld [vmem:[#allocation2 + $0x538] sm:$0xff]  ;;  %v1004_v49 = vld [vmem:[#allocation2 + $0x550] sm:$0xff] }
 0x2c6   :  { %v1612_v45 = vpack.c.bf16 %v863_v44, %v861_v43  ;;  %v994_v32 = vld [vmem:[#allocation2 + $0x500] sm:$0xff]  ;;  %v1000_v44 = vld [vmem:[#allocation2 + $0x530] sm:$0xff]  ;;  %v1005_v46 = vld [vmem:[#allocation2 + $0x558] sm:$0xff] }
 0x2c7   :  { %1593 = vmatpush1.bf16.msra.mxu0 %v1592_v11  ;;  %v1632_v11 = vpack.c.bf16 %v980_v8, %v978_v6  ;;  %v1648_v37 = vpack.c.bf16 %v996_v33, %v994_v32  ;;  %v998_v43 = vld [vmem:[#allocation2 + $0x520] sm:$0xff]  ;;  %v1011_v55 = vld [vmem:[#allocation2 + $0x588] sm:$0xff]  ;;  %v1013_v56 = vld [vmem:[#allocation2 + $0x598] sm:$0xff] }
 0x2c8   :  { %1541 = vmatpush1.bf16.msra.mxu1 %v1540_v52  ;;  %1595 = vmatprep.subr.bf16.mxu0 %v1594_v12  ;;  %v1618_v52 = vpack.c.bf16 %v969_v51, %v967_v50  ;;  %v1652_v47 = vpack.c.bf16 %v1000_v44, %v998_v43  ;;  %v1007_v50 = vld [vmem:[#allocation2 + $0x568] sm:$0xff]  ;;  %v1009_v51 = vld [vmem:[#allocation2 + $0x578] sm:$0xff]  ;;  %v1010_v59 = vld [vmem:[#allocation2 + $0x580] sm:$0xff] }
 0x2c9   :  { %1543 = vmatprep.subr.bf16.mxu1 %v1542_v53  ;;  %v966_v53 = vld [vmem:[#allocation2 + $0x420] sm:$0xff]  ;;  %v1012_v41 = vld [vmem:[#allocation2 + $0x590] sm:$0xff]  ;;  %v1023_v25 = vld [vmem:[#allocation2 + $0x5e8] sm:$0xff] }
 0x2ca   :  { %v1620_v57 = vpack.c.bf16 %v968_v54, %v966_v53  ;;  %v1006_v53 = vld [vmem:[#allocation2 + $0x560] sm:$0xff]  ;;  %v1008_v54 = vld [vmem:[#allocation2 + $0x570] sm:$0xff]  ;;  %v1025_v26 = vld [vmem:[#allocation2 + $0x5f8] sm:$0xff] }
 0x2cb   :  { %1597 = vmatpush1.bf16.msra.mxu0 %v1596_v17  ;;  %v1636_v17 = vpack.c.bf16 %v984_v13, %v982_v7  ;;  %v1394_v2 = vld [vmem:[%s2301_s1 + $0x81] ss:$8 sm:$0x3]  ;;  %v792_v13 = vrot.slane %v2161_v27, 2  ;;  %v1126_v33 = vld [vmem:[#allocation2 + $0x618] sm:$0xff] }
 0x2cc   :  { %1545 = vmatpush1.bf16.msra.mxu1 %v1544_v62  ;;  %1599 = vmatprep.subr.bf16.mxu0 %v1598_v18  ;;  %v1626_v62 = vpack.c.bf16 %v977_v60, %v975_v42  ;;  %v1638_v18 = vpack.c.bf16 %v989_v16, %v987_v15  ;;  %v1015_v42 = vld [vmem:[#allocation2 + $0x5a8] sm:$0xff]  ;;  %v1017_v60 = vld [vmem:[#allocation2 + $0x5b8] sm:$0xff] }
 0x2cd   :  { %1547 = vmatprep.subr.bf16.mxu1 %v1546_v63  ;;  %v974_v63 = vld [vmem:[#allocation2 + $0x460] sm:$0xff]  ;;  %v1124_v32 = vld [vmem:[#allocation2 + $0x608] sm:$0xff]  ;;  %v1130_v43 = vld [vmem:[#allocation2 + $0x638] sm:$0xff] }
 0x2ce   :  { %v1628_v4 = vpack.c.bf16 %v976_v0, %v974_v63  ;;  %v1014_v63 = vld [vmem:[#allocation2 + $0x5a0] sm:$0xff]  ;;  %v1016_v0 = vld [vmem:[#allocation2 + $0x5b0] sm:$0xff] }
 0x2cf   :  { %1601 = vmatpush1.bf16.msra.mxu0 %v1600_v23  ;;  %v1640_v23 = vpack.c.bf16 %v988_v20, %v986_v19  ;;  %v1668_v1 = vpack.c.bf16 %v1016_v0, %v1014_v63  ;;  %v1019_v19 = vld [vmem:[#allocation2 + $0x5c8] sm:$0xff]  ;;  %v1021_v20 = vld [vmem:[#allocation2 + $0x5d8] sm:$0xff] }
 0x2d0   :  { %1549 = vmatpush1.bf16.msra.mxu1 %v1548_v10  ;;  %1603 = vmatprep.subr.bf16.mxu0 %v1602_v24  ;;  %v985_v10 = vld [vmem:[#allocation2 + $0x4b8] sm:$0xff]  ;;  %v1642_v24 = vpack.c.bf16 %v993_v22, %v991_v21  ;;  %v1670_v21 = vpack.c.bf16 %v1021_v20, %v1019_v19  ;;  %v1018_v22 = vld [vmem:[#allocation2 + $0x5c0] sm:$0xff] }
 0x2d1   :  { %1615 = vmatprep.subr.bf16.mxu1 %v1614_v48  ;;  %v1634_v12 = vpack.c.bf16 %v985_v10, %v983_v9  ;;  %v1002_v48 = vld [vmem:[#allocation2 + $0x540] sm:$0xff]  ;;  %v1146_v63 = vld [vmem:[#allocation2 + $0x6b8] sm:$0xff] }
 0x2d2   :  { %v1158_v19 = vld [vmem:[#allocation2 + $0x718] sm:$0xff] }
 0x2d3   :  { %780 = vmatmul.mubr.f32.vlgmr.msra.gmra.mrb[0].mxu1 %v2161_v27  ;;  %1605 = vmatpush1.bf16.msra.mxu0 %v1604_v34  ;;  %v995_v34 = vld [vmem:[#allocation2 + $0x508] sm:$0xff] }
 0x2d4   :  { %1607 = vmatprep.subr.bf16.mxu0 %v1606_v31  ;;  %1617 = vmatpush1.bf16.msra.mxu1 %v1616_v40  ;;  %v1646_v31 = vpack.c.bf16 %v997_v29, %v995_v34  ;;  %v1656_v40 = vpack.c.bf16 %v1004_v49, %v1002_v48  ;;  %v1674_v34 = vpack.c.bf16 %v1025_v26, %v1023_v25  ;;  %v1022_v29 = vld [vmem:[#allocation2 + $0x5e0] sm:$0xff]  ;;  %v1134_v48 = vld [vmem:[#allocation2 + $0x658] sm:$0xff] }
 0x2d5   :  { %1619 = vmatprep.subr.bf16.mxu1 %v1618_v52  ;;  %v1658_v52 = vpack.c.bf16 %v1009_v51, %v1007_v50  ;;  %v1131_v51 = vld [vmem:[#allocation2 + $0x640] sm:$0xff]  ;;  %v1162_v25 = vld [vmem:[#allocation2 + $0x738] sm:$0xff] }
 0x2d7   :  { %1609 = vmatpush1.bf16.msra.mxu0 %v1608_v35  ;;  %v999_v35 = vld [vmem:[#allocation2 + $0x528] sm:$0xff] }
 0x2d8   :  { %1611 = vmatprep.subr.bf16.mxu0 %v1610_v38  ;;  %1621 = vmatpush1.bf16.msra.mxu1 %v1620_v57  ;;  %v1650_v38 = vpack.c.bf16 %v1001_v36, %v999_v35  ;;  %v1660_v57 = vpack.c.bf16 %v1008_v54, %v1006_v53  ;;  %v1123_v35 = vld [vmem:[#allocation2 + $0x600] sm:$0xff]  ;;  %v1678_v36 = vpack.c.bf16 %v1126_v33, %v1124_v32  ;;  %v1138_v53 = vld [vmem:[#allocation2 + $0x678] sm:$0xff] }
 0x2d9   :  { %1623 = vmatprep.subr.bf16.mxu1 %v1622_v58  ;;  %v1662_v58 = vpack.c.bf16 %v1013_v56, %v1011_v55  ;;  %v1135_v56 = vld [vmem:[#allocation2 + $0x660] sm:$0xff]  ;;  %v1166_v32 = vld [vmem:[#allocation2 + $0x758] sm:$0xff] }
 0x2db   :  { %1613 = vmatpush1.bf16.msra.mxu0 %v1612_v45  ;;  %v1003_v45 = vld [vmem:[#allocation2 + $0x548] sm:$0xff] }
 0x2dc   :  { %1625 = vmatpush1.bf16.msra.mxu1 %v1624_v61  ;;  %v1654_v39 = vpack.c.bf16 %v1005_v46, %v1003_v45  ;;  %v1664_v61 = vpack.c.bf16 %v1012_v41, %v1010_v59  ;;  %v1127_v46 = vld [vmem:[#allocation2 + $0x620] sm:$0xff]  ;;  %1679 = vmatprep.subr.bf16.mxu0 %v1678_v36  ;;  %v1142_v59 = vld [vmem:[#allocation2 + $0x698] sm:$0xff] }
 0x2dd   :  { %1627 = vmatprep.subr.bf16.mxu1 %v1626_v62  ;;  %v1666_v62 = vpack.c.bf16 %v1017_v60, %v1015_v42  ;;  %v1139_v60 = vld [vmem:[#allocation2 + $0x680] sm:$0xff] }
 0x2de   :  { %v1163_v36 = vld [vmem:[#allocation2 + $0x740] sm:$0xff] }
 0x2e0   :  { %1629 = vmatpush1.bf16.msra.mxu1 %v1628_v4  ;;  %v708_v4 = vrot.slane %v1394_v2, %v2147_v3 }
 0x2e1   :  { %1631 = vmatprep.subr.bf16.mxu1 %v1630_v5  ;;  %v712_v5 = vrot.slane %v1394_v2, %v2154_v14  ;;  %v1143_v2 = vld [vmem:[#allocation2 + $0x6a0] sm:$0xff] }
 0x2e4   :  { %1633 = vmatpush1.bf16.msra.mxu1 %v1632_v11 }
 0x2e5   :  { %1635 = vmatprep.subr.bf16.mxu1 %v1634_v12  ;;  %v793_v12 = vrot.slane %v2163_v28, 2 }
 0x2e8   :  { %1637 = vmatpush1.bf16.msra.mxu1 %v1636_v17 }
 0x2e9   :  { %1639 = vmatprep.subr.bf16.mxu1 %v1638_v18 }
 0x2ec   :  { %1641 = vmatpush1.bf16.msra.mxu1 %v1640_v23  ;;  %v1020_v23 = vld [vmem:[#allocation2 + $0x5d0] sm:$0xff] }
 0x2ed   :  { %1643 = vmatprep.subr.bf16.mxu1 %v1642_v24  ;;  %v1672_v24 = vpack.c.bf16 %v1020_v23, %v1018_v22  ;;  %v1155_v22 = vld [vmem:[#allocation2 + $0x700] sm:$0xff]  ;;  %v1157_v23 = vld [vmem:[#allocation2 + $0x710] sm:$0xff] }
 0x2ee   :  { %v1712_v26 = vpack.c.bf16 %v1157_v23, %v1155_v22  ;;  %v1292_v22 = vld [vmem:[%s2303_s2 + $0x80] sm:$0xff]  ;;  %v1293_v23 = vld [vmem:[%s2303_s2 + $0x88] sm:$0xff] }
 0x2f0   :  { %1645 = vmatpush1.bf16.msra.mxu1 %v1644_v30  ;;  %v1024_v30 = vld [vmem:[#allocation2 + $0x5f0] sm:$0xff] }
 0x2f1   :  { %1647 = vmatprep.subr.bf16.mxu1 %v1646_v31  ;;  %v1676_v31 = vpack.c.bf16 %v1024_v30, %v1022_v29  ;;  %v1159_v29 = vld [vmem:[#allocation2 + $0x720] sm:$0xff]  ;;  %v1161_v30 = vld [vmem:[#allocation2 + $0x730] sm:$0xff] }
 0x2f2   :  { %v1716_v33 = vpack.c.bf16 %v1161_v30, %v1159_v29  ;;  %v1295_v29 = vld [vmem:[%s2303_s2 + $0x98] sm:$0xff] }
 0x2f4   :  { %1649 = vmatpush1.bf16.msra.mxu1 %v1648_v37  ;;  %v1125_v37 = vld [vmem:[#allocation2 + $0x610] sm:$0xff] }
 0x2f5   :  { %1651 = vmatprep.subr.bf16.mxu1 %v1650_v38  ;;  %v1128_v38 = vld [vmem:[#allocation2 + $0x628] sm:$0xff]  ;;  %v1680_v44 = vpack.c.bf16 %v1125_v37, %v1123_v35  ;;  %v1165_v37 = vld [vmem:[#allocation2 + $0x750] sm:$0xff] }
 0x2f6   :  { %v1682_v45 = vpack.c.bf16 %v1130_v43, %v1128_v38  ;;  %v1168_v38 = vld [vmem:[#allocation2 + $0x768] sm:$0xff]  ;;  %v1170_v43 = vld [vmem:[#allocation2 + $0x778] sm:$0xff] }
 0x2f8   :  { %1653 = vmatpush1.bf16.msra.mxu1 %v1652_v47  ;;  %v1129_v47 = vld [vmem:[#allocation2 + $0x630] sm:$0xff] }
 0x2f9   :  { %1655 = vmatprep.subr.bf16.mxu1 %v1654_v39  ;;  %v1132_v39 = vld [vmem:[#allocation2 + $0x648] sm:$0xff]  ;;  %v1684_v49 = vpack.c.bf16 %v1129_v47, %v1127_v46  ;;  %v1167_v46 = vld [vmem:[#allocation2 + $0x760] sm:$0xff]  ;;  %v1169_v47 = vld [vmem:[#allocation2 + $0x770] sm:$0xff] }
 0x2fa   :  { %v1686_v50 = vpack.c.bf16 %v1134_v48, %v1132_v39  ;;  %v1172_v39 = vld [vmem:[#allocation2 + $0x788] sm:$0xff]  ;;  %v1174_v48 = vld [vmem:[#allocation2 + $0x798] sm:$0xff] }
 0x2fc   :  { %1657 = vmatpush1.bf16.msra.mxu1 %v1656_v40  ;;  %v1133_v40 = vld [vmem:[#allocation2 + $0x650] sm:$0xff] }
 0x2fd   :  { %1659 = vmatprep.subr.bf16.mxu1 %v1658_v52  ;;  %v1136_v52 = vld [vmem:[#allocation2 + $0x668] sm:$0xff]  ;;  %v1688_v54 = vpack.c.bf16 %v1133_v40, %v1131_v51  ;;  %v1171_v51 = vld [vmem:[#allocation2 + $0x780] sm:$0xff]  ;;  %v1173_v40 = vld [vmem:[#allocation2 + $0x790] sm:$0xff] }
 0x2fe   :  { %v1690_v55 = vpack.c.bf16 %v1138_v53, %v1136_v52  ;;  %v1176_v52 = vld [vmem:[#allocation2 + $0x7a8] sm:$0xff]  ;;  %v1178_v53 = vld [vmem:[#allocation2 + $0x7b8] sm:$0xff] }
 0x300   :  { %1661 = vmatpush1.bf16.msra.mxu1 %v1660_v57  ;;  %v1137_v57 = vld [vmem:[#allocation2 + $0x670] sm:$0xff] }
 0x301   :  { %1663 = vmatprep.subr.bf16.mxu1 %v1662_v58  ;;  %v1140_v58 = vld [vmem:[#allocation2 + $0x688] sm:$0xff]  ;;  %v1692_v41 = vpack.c.bf16 %v1137_v57, %v1135_v56  ;;  %v1175_v56 = vld [vmem:[#allocation2 + $0x7a0] sm:$0xff]  ;;  %v1177_v57 = vld [vmem:[#allocation2 + $0x7b0] sm:$0xff] }
 0x302   :  { %v1694_v42 = vpack.c.bf16 %v1142_v59, %v1140_v58  ;;  %v1732_v58 = vpack.c.bf16 %v1177_v57, %v1175_v56  ;;  %v1395_v59 = vld [vmem:[%s2301_s1 + $0x82] ss:$8 sm:$0x3]  ;;  %v1303_v56 = vld [vmem:[%s2303_s2 + $0xd8] sm:$0xff] }
 0x304   :  { %1665 = vmatpush1.bf16.msra.mxu1 %v1664_v61  ;;  %v1141_v61 = vld [vmem:[#allocation2 + $0x690] sm:$0xff] }
 0x305   :  { %1667 = vmatprep.subr.bf16.mxu1 %v1666_v62  ;;  %v1144_v62 = vld [vmem:[#allocation2 + $0x6a8] sm:$0xff]  ;;  %v1696_v0 = vpack.c.bf16 %v1141_v61, %v1139_v60 }
 0x308   :  { %1669 = vmatpush1.bf16.msra.mxu1 %v1668_v1  ;;  %v1698_v1 = vpack.c.bf16 %v1146_v63, %v1144_v62 }
 0x309   :  { %1671 = vmatprep.subr.bf16.mxu1 %v1670_v21 }
 0x30c   :  { %1673 = vmatpush1.bf16.msra.mxu1 %v1672_v24  ;;  %v1160_v24 = vld [vmem:[#allocation2 + $0x728] sm:$0xff] }
 0x30d   :  { %1675 = vmatprep.subr.bf16.mxu1 %v1674_v34  ;;  %v1714_v34 = vpack.c.bf16 %v1162_v25, %v1160_v24  ;;  %v1276_v24 = vld [vmem:[%s2303_s2] sm:$0xff]  ;;  %v1742_v25 = vpack.c.bf16 %v1293_v23, %v1292_v22 }
 0x30e   :  { %v1397_v23 = vld [vmem:[%s2301_s1 + $0x84] ss:$8 sm:$0x3] }
 0x310   :  { %1677 = vmatpush1.bf16.msra.mxu1 %v1676_v31  ;;  %v1164_v31 = vld [vmem:[#allocation2 + $0x748] sm:$0xff] }
 0x311   :  { %v1718_v35 = vpack.c.bf16 %v1166_v32, %v1164_v31  ;;  %v1278_v32 = vld [vmem:[%s2303_s2 + $0x10] sm:$0xff]  ;;  %1743 = vmatprep.subr.bf16.mxu1 %v1742_v25  ;;  %v1195_v25 = vrot.slane %v1397_v23, %v2154_v14 }
 0x3a6   :  { %v781_v6 = vpop.f32.mrb[0].mxu1 }
 0x3a7   :  { %v782_v8 = vadd.f32 %v781_v6, %v708_v4  ;;  %v783_v9 = vpop.f32.mrb[1].mxu1  ;;  %v1145_v4 = vld [vmem:[#allocation2 + $0x6b0] sm:$0xff]  ;;  %v1150_v6 = vld [vmem:[#allocation2 + $0x6d8] sm:$0xff] }
 0x3a8   :  { %v784_v10 = vadd.f32 %v783_v9, %v712_v5  ;;  %v1148_v5 = vld [vmem:[#allocation2 + $0x6c8] sm:$0xff] }
 0x3a9   :  { %vm786_vm15 = vcmp.gt.f32.partialorder %v782_v8, 0.0  ;;  %v788_v11 = vmul.f32 0.2, %v782_v8  ;;  %v1702_v9 = vpack.c.bf16 %v1150_v6, %v1148_v5 }
 0x3aa   :  { %v789_v7 = vmul.f32 0.2, %v784_v10  ;;  %vm787_vm0 = vcmp.gt.f32.partialorder %v784_v10, 0.0 }
 0x3ab   :  { %v790_v15 = vsel %vm786_vm15, %v782_v8, %v788_v11  ;;  %v1700_v8 = vpack.c.bf16 %v1145_v4, %v1143_v2  ;;  %v1149_v11 = vld [vmem:[#allocation2 + $0x6d0] sm:$0xff]  ;;  %v953_v2 = vrot.slane %v2161_v27, 4 }
 0x3ac   :  { %v791_v16 = vsel %vm787_vm0, %v784_v10, %v789_v7  ;;  %v796_v18 = vadd.f32 %v792_v13, %v790_v15  ;;  %v1147_v10 = vld [vmem:[#allocation2 + $0x6c0] sm:$0xff]  ;;  %v1154_v7 = vld [vmem:[#allocation2 + $0x6f8] sm:$0xff] }
 0x3ad   :  { %v797_v17 = vadd.f32 %v793_v12, %v791_v16  ;;  %v1152_v12 = vld [vmem:[#allocation2 + $0x6e8] sm:$0xff]  ;;  %v1704_v13 = vpack.c.bf16 %v1149_v11, %v1147_v10  ;;  %v1151_v16 = vld [vmem:[#allocation2 + $0x6e0] sm:$0xff]  ;;  %v1182_v11 = vld [vmem:[#allocation2 + $0x7d8] sm:$0xff] }
 0x3ae   :  { %v1706_v15 = vpack.c.bf16 %v1154_v7, %v1152_v12  ;;  %v1180_v10 = vld [vmem:[#allocation2 + $0x7c8] sm:$0xff]  ;;  %v1179_v7 = vld [vmem:[#allocation2 + $0x7c0] sm:$0xff] }
 0x3af   :  { %940 = vmatprep.mubr.f32.mxu0 %v797_v17  ;;  %v1153_v17 = vld [vmem:[#allocation2 + $0x6f0] sm:$0xff]  ;;  %v1734_v12 = vpack.c.bf16 %v1182_v11, %v1180_v10 }
 0x3b0   :  { %941 = vmatmul.mubr.f32.vlgmr.msra.gmra.mrb[6].mxu0 %v796_v18  ;;  %v1156_v18 = vld [vmem:[#allocation2 + $0x708] sm:$0xff]  ;;  %v1708_v20 = vpack.c.bf16 %v1153_v17, %v1151_v16  ;;  %v1186_v17 = vld [vmem:[#allocation2 + $0x7f8] sm:$0xff] }
 0x3b1   :  { %1681 = vmatpush1.bf16.msra.mxu0 %v1680_v44  ;;  %v1710_v21 = vpack.c.bf16 %v1158_v19, %v1156_v18  ;;  %v1720_v44 = vpack.c.bf16 %v1165_v37, %v1163_v36  ;;  %v1184_v16 = vld [vmem:[#allocation2 + $0x7e8] sm:$0xff]  ;;  %v1183_v19 = vld [vmem:[#allocation2 + $0x7e0] sm:$0xff] }
 0x3b2   :  { %1683 = vmatprep.subr.bf16.mxu0 %v1682_v45  ;;  %v1722_v45 = vpack.c.bf16 %v1170_v43, %v1168_v38  ;;  %v1738_v18 = vpack.c.bf16 %v1186_v17, %v1184_v16  ;;  %v1297_v36 = vld [vmem:[%s2303_s2 + $0xa8] sm:$0xff]  ;;  %v1280_v43 = vld [vmem:[%s2303_s2 + $0x20] sm:$0xff]  ;;  %v1306_v17 = vld [vmem:[%s2303_s2 + $0xf0] sm:$0xff] }
 0x3b5   :  { %1685 = vmatpush1.bf16.msra.mxu0 %v1684_v49  ;;  %v1724_v49 = vpack.c.bf16 %v1169_v47, %v1167_v46  ;;  %v1299_v46 = vld [vmem:[%s2303_s2 + $0xb8] sm:$0xff] }
 0x3b6   :  { %1687 = vmatprep.subr.bf16.mxu0 %v1686_v50  ;;  %v1726_v50 = vpack.c.bf16 %v1174_v48, %v1172_v39  ;;  %v1282_v48 = vld [vmem:[%s2303_s2 + $0x30] sm:$0xff] }
 0x3b9   :  { %1689 = vmatpush1.bf16.msra.mxu0 %v1688_v54  ;;  %v1728_v54 = vpack.c.bf16 %v1173_v40, %v1171_v51  ;;  %v1301_v51 = vld [vmem:[%s2303_s2 + $0xc8] sm:$0xff] }
 0x3ba   :  { %1691 = vmatprep.subr.bf16.mxu0 %v1690_v55  ;;  %v1730_v55 = vpack.c.bf16 %v1178_v53, %v1176_v52  ;;  %v1284_v53 = vld [vmem:[%s2303_s2 + $0x40] sm:$0xff] }
 0x3bd   :  { %1693 = vmatpush1.bf16.msra.mxu0 %v1692_v41  ;;  %v869_v41 = vrot.slane %v1395_v59, %v2147_v3 }
 0x3be   :  { %1695 = vmatprep.subr.bf16.mxu0 %v1694_v42  ;;  %v873_v42 = vrot.slane %v1395_v59, %v2154_v14  ;;  %v1286_v59 = vld [vmem:[%s2303_s2 + $0x50] sm:$0xff] }
 0x3c1   :  { %1697 = vmatpush1.bf16.msra.mxu0 %v1696_v0 }
 0x3c2   :  { %1699 = vmatprep.subr.bf16.mxu0 %v1698_v1  ;;  %v954_v1 = vrot.slane %v2163_v28, 4 }
 0x3c5   :  { %1701 = vmatpush1.bf16.msra.mxu0 %v1700_v8 }
 0x3c6   :  { %1703 = vmatprep.subr.bf16.mxu0 %v1702_v9 }
 0x3c9   :  { %1705 = vmatpush1.bf16.msra.mxu0 %v1704_v13  ;;  %v1181_v13 = vld [vmem:[#allocation2 + $0x7d0] sm:$0xff] }
 0x3ca   :  { %1707 = vmatprep.subr.bf16.mxu0 %v1706_v15  ;;  %v1736_v15 = vpack.c.bf16 %v1181_v13, %v1179_v7  ;;  %v1304_v7 = vld [vmem:[%s2303_s2 + $0xe0] sm:$0xff]  ;;  %v1305_v13 = vld [vmem:[%s2303_s2 + $0xe8] sm:$0xff] }
 0x3cd   :  { %1709 = vmatpush1.bf16.msra.mxu0 %v1708_v20  ;;  %v1185_v20 = vld [vmem:[#allocation2 + $0x7f0] sm:$0xff] }
 0x3ce   :  { %1711 = vmatprep.subr.bf16.mxu0 %v1710_v21  ;;  %v1740_v21 = vpack.c.bf16 %v1185_v20, %v1183_v19  ;;  %v1290_v20 = vld [vmem:[%s2303_s2 + $0x70] sm:$0xff] }
 0x3d1   :  { %1713 = vmatpush1.bf16.msra.mxu0 %v1712_v26  ;;  %v1277_v26 = vld [vmem:[%s2303_s2 + $0x8] sm:$0xff] }
 0x3d2   :  { %1715 = vmatprep.subr.bf16.mxu0 %v1714_v34  ;;  %v1294_v34 = vld [vmem:[%s2303_s2 + $0x90] sm:$0xff]  ;;  %v1744_v30 = vpack.c.bf16 %v1277_v26, %v1276_v24  ;;  %v1191_v24 = vrot.slane %v1397_v23, %v2147_v3 }
 0x3d3   :  { %v1746_v31 = vpack.c.bf16 %v1295_v29, %v1294_v34 }
 0x3d5   :  { %1717 = vmatpush1.bf16.msra.mxu0 %v1716_v33  ;;  %v1279_v33 = vld [vmem:[%s2303_s2 + $0x18] sm:$0xff] }
 0x3d6   :  { %1719 = vmatprep.subr.bf16.mxu0 %v1718_v35  ;;  %v1296_v35 = vld [vmem:[%s2303_s2 + $0xa0] sm:$0xff]  ;;  %v1748_v37 = vpack.c.bf16 %v1279_v33, %v1278_v32 }
 0x3d7   :  { %v1750_v38 = vpack.c.bf16 %v1297_v36, %v1296_v35 }
 0x3d9   :  { %1721 = vmatpush1.bf16.msra.mxu0 %v1720_v44  ;;  %v1281_v44 = vld [vmem:[%s2303_s2 + $0x28] sm:$0xff] }
 0x3da   :  { %1723 = vmatprep.subr.bf16.mxu0 %v1722_v45  ;;  %v1298_v45 = vld [vmem:[%s2303_s2 + $0xb0] sm:$0xff]  ;;  %v1752_v47 = vpack.c.bf16 %v1281_v44, %v1280_v43 }
 0x3db   :  { %v1754_v39 = vpack.c.bf16 %v1299_v46, %v1298_v45 }
 0x3dd   :  { %1725 = vmatpush1.bf16.msra.mxu0 %v1724_v49  ;;  %v1283_v49 = vld [vmem:[%s2303_s2 + $0x38] sm:$0xff] }
 0x3de   :  { %1727 = vmatprep.subr.bf16.mxu0 %v1726_v50  ;;  %v1300_v50 = vld [vmem:[%s2303_s2 + $0xc0] sm:$0xff]  ;;  %v1756_v40 = vpack.c.bf16 %v1283_v49, %v1282_v48 }
 0x3df   :  { %v1758_v52 = vpack.c.bf16 %v1301_v51, %v1300_v50 }
 0x3e1   :  { %1729 = vmatpush1.bf16.msra.mxu0 %v1728_v54  ;;  %v1285_v54 = vld [vmem:[%s2303_s2 + $0x48] sm:$0xff] }
 0x3e2   :  { %1731 = vmatprep.subr.bf16.mxu0 %v1730_v55  ;;  %v1302_v55 = vld [vmem:[%s2303_s2 + $0xd0] sm:$0xff]  ;;  %v1760_v57 = vpack.c.bf16 %v1285_v54, %v1284_v53 }
 0x3e5   :  { %1733 = vmatpush1.bf16.msra.mxu0 %v1732_v58  ;;  %v1762_v58 = vpack.c.bf16 %v1303_v56, %v1302_v55 }
 0x3e6   :  { %1735 = vmatprep.subr.bf16.mxu0 %v1734_v12 }
 0x3e9   :  { %1737 = vmatpush1.bf16.msra.mxu0 %v1736_v15  ;;  %v1766_v15 = vpack.c.bf16 %v1305_v13, %v1304_v7 }
 0x3ea   :  { %1739 = vmatprep.subr.bf16.mxu0 %v1738_v18  ;;  %v1307_v18 = vld [vmem:[%s2303_s2 + $0xf8] sm:$0xff] }
 0x3eb   :  { %v1770_v19 = vpack.c.bf16 %v1307_v18, %v1306_v17 }
 0x3ed   :  { %1741 = vmatpush1.bf16.msra.mxu0 %v1740_v21  ;;  %v1291_v21 = vld [vmem:[%s2303_s2 + $0x78] sm:$0xff] }
 0x3ee   :  { %v1772_v22 = vpack.c.bf16 %v1291_v21, %v1290_v20 }
 0x483   :  { %v942_v60 = vpop.f32.mrb[6].mxu0 }
 0x484   :  { %v943_v61 = vadd.f32 %v942_v60, %v869_v41  ;;  %v944_v62 = vpop.f32.mrb[7].mxu0  ;;  %v1287_v41 = vld [vmem:[%s2303_s2 + $0x58] sm:$0xff]  ;;  %v1396_v60 = vld [vmem:[%s2301_s1 + $0x83] ss:$8 sm:$0x3] }
 0x485   :  { %v945_v63 = vadd.f32 %v944_v62, %v873_v42  ;;  %v1764_v42 = vpack.c.bf16 %v1287_v41, %v1286_v59  ;;  %v1034_v62 = vrot.slane %v1396_v60, %v2154_v14 }
 0x486   :  { %vm947_vm1 = vcmp.gt.f32.partialorder %v943_v61, 0.0  ;;  %v949_v0 = vmul.f32 0.2, %v943_v61 }
 0x487   :  { %vm948_vm2 = vcmp.gt.f32.partialorder %v945_v63, 0.0  ;;  %v950_v4 = vmul.f32 0.2, %v945_v63 }
 0x488   :  { %v951_v5 = vsel %vm947_vm1, %v943_v61, %v949_v0  ;;  %v1030_v61 = vrot.slane %v1396_v60, %v2147_v3 }
 0x489   :  { %v952_v6 = vsel %vm948_vm2, %v945_v63, %v950_v4  ;;  %v957_v9 = vadd.f32 %v953_v2, %v951_v5  ;;  %v1115_v5 = vrot.slane %v2163_v28, 6  ;;  %v1289_v28 = vld [vmem:[%s2303_s2 + $0x68] sm:$0xff] }
 0x48a   :  { %v958_v8 = vadd.f32 %v954_v1, %v952_v6  ;;  %v1114_v6 = vrot.slane %v2161_v27, 6  ;;  %v1288_v27 = vld [vmem:[%s2303_s2 + $0x60] sm:$0xff] }
 0x48b   :  { %v1768_v16 = vpack.c.bf16 %v1289_v28, %v1288_v27 }
 0x48c   :  { %1101 = vmatprep.mubr.f32.mxu1 %v958_v8 }
 0x48d   :  { %1102 = vmatmul.mubr.f32.vlgmr.msra.gmra.mrb[2].mxu1 %v957_v9 }
 0x48e   :  { %1745 = vmatpush3.bf16.msra.mxu1 %v1744_v30 }
 0x48f   :  { %1747 = vmatprep.subr.bf16.mxu1 %v1746_v31 }
 0x492   :  { %1749 = vmatpush3.bf16.msra.mxu1 %v1748_v37  ;;  %v1275_v37 = vld [vmem:[%s2301_s1 + $0x85] ss:$0 sm:$0xff] }
 0x493   :  { %1751 = vmatprep.subr.bf16.mxu1 %v1750_v38 }
 0x496   :  { %1753 = vmatpush3.bf16.msra.mxu1 %v1752_v47 }
 0x497   :  { %1755 = vmatprep.subr.bf16.mxu1 %v1754_v39 }
 0x49a   :  { %1757 = vmatpush3.bf16.msra.mxu1 %v1756_v40 }
 0x49b   :  { %1759 = vmatprep.subr.bf16.mxu1 %v1758_v52 }
 0x49e   :  { %1761 = vmatpush3.bf16.msra.mxu1 %v1760_v57 }
 0x49f   :  { %1763 = vmatprep.subr.bf16.mxu1 %v1762_v58 }
 0x4a2   :  { %1765 = vmatpush3.bf16.msra.mxu1 %v1764_v42 }
 0x4a3   :  { %1767 = vmatprep.subr.bf16.mxu1 %v1766_v15 }
 0x4a6   :  { %1769 = vmatpush3.bf16.msra.mxu1 %v1768_v16 }
 0x4a7   :  { %1771 = vmatprep.subr.bf16.mxu1 %v1770_v19 }
 0x4aa   :  { %1773 = vmatpush3.bf16.msra.mxu1 %v1772_v22 }
 0x560   :  { %v1103_v63 = vpop.f32.mrb[2].mxu1 }
 0x561   :  { %v1104_v0 = vadd.f32 %v1103_v63, %v1030_v61  ;;  %v1105_v1 = vpop.f32.mrb[3].mxu1 }
 0x562   :  { %v1106_v2 = vadd.f32 %v1105_v1, %v1034_v62 }
 0x563   :  { %vm1108_vm3 = vcmp.gt.f32.partialorder %v1104_v0, 0.0  ;;  %v1110_v4 = vmul.f32 0.2, %v1104_v0 }
 0x564   :  { %vm1109_vm4 = vcmp.gt.f32.partialorder %v1106_v2, 0.0  ;;  %v1111_v8 = vmul.f32 0.2, %v1106_v2 }
 0x565   :  { %v1112_v9 = vsel %vm1108_vm3, %v1104_v0, %v1110_v4 }
 0x566   :  { %v1113_v10 = vsel %vm1109_vm4, %v1106_v2, %v1111_v8  ;;  %v1118_v12 = vadd.f32 %v1114_v6, %v1112_v9 }
 0x567   :  { %v1119_v11 = vadd.f32 %v1115_v5, %v1113_v10 }
 0x569   :  { %1262 = vmatprep.mubr.f32.mxu0 %v1119_v11 }
 0x56a   :  { %1263 = vmatmul.mubr.f32.vlgmr.msra.gmra.mrb[8].mxu0 %v1118_v12 }
 0x63d   :  { %v1264_v26 = vpop.f32.mrb[8].mxu0 }
 0x63e   :  { %v1265_v34 = vadd.f32 %v1264_v26, %v1191_v24  ;;  %v1266_v29 = vpop.f32.mrb[9].mxu0 }
 0x63f   :  { %v1267_v30 = vadd.f32 %v1266_v29, %v1195_v25 }
 0x640   :  { %v1271_v31 = vmul.f32 0.2, %v1265_v34  ;;  %vm1269_vm5 = vcmp.gt.f32.partialorder %v1265_v34, 0.0 }
 0x641   :  { %v1272_v32 = vmul.f32 0.2, %v1267_v30  ;;  %vm1270_vm6 = vcmp.gt.f32.partialorder %v1267_v30, 0.0 }
 0x642   :  { %v1273_v35 = vsel %vm1269_vm5, %v1265_v34, %v1271_v31 }
 0x643   :  { %v1274_v33 = vsel %vm1270_vm6, %v1267_v30, %v1272_v32 }
 0x644   :  { %1372 = vmatprep.mubr.f32.mxu1 %v1274_v33 }
 0x645   :  { %1373 = vmatmul.mubr.f32.vlgmr.msra.gmra.mrb[4].mxu1 %v1273_v35 }
 0x718   :  { %v1441_v36 = vpop.f32.mrb[4].mxu1 }
 0x719   :  { %v1442_v3 = vpop.f32.mrb[5].mxu1 }
 0x71a   :  { %v1443_v38 = vadd.f32 %v1442_v3, %v1441_v36 }
 0x71c   :  { %v1375_v14 = vadd.f32 %v1443_v38, %v1275_v37 }
 0x71e   :  { %1378 = vst [vmem:[%s2304_s4 + $0x6] sm:$0x3] %v1375_v14 }
 0x71f   :  { %1383 = vsyncmov [#allocation3] }
 0x722   :  { %s1384_s16 = vpop.sfrf %1383 }
 0x723   :  { %p1398_p8 = scmp.ne.s32.totalorder %s1384_s16, 0 }
 0x725   :  { %1388 = shalt.err (%p1398_p8)  }

</bundles_post_ra>
